<compile_context>
chip_gen: v5e
topology: v5e:2x2
jax: 0.10.0
libtpu: 0.0.40
codegen_flags: <defaults>
</compile_context>

<pallas_src>
import jax
import jax.numpy as jnp
from jax.experimental import pallas as pl
from jax.experimental.pallas import tpu as pltpu


def _round_up(v, m):
    return ((v + m - 1) // m) * m


def dattention_kernel(n_ref,                      # SMEM scalar prefetch: [N]
                      x_ref, w1_ref, b1_ref,      # feature head
                      wa1_ref, ba1_ref,           # attention layer 1
                      wa2_ref, ba2_ref,           # attention layer 2 (as (1, D) row)
                      wc_ref, bc_ref,             # classifier (lane-padded)
                      logits_ref,                 # (1, C_pad) output
                      m_sc, l_sc, acc_sc):        # online-softmax scratch
    i = pl.program_id(0)
    tn = x_ref.shape[0]

    @pl.when(i == 0)
    def _():
        m_sc[...] = jnp.full_like(m_sc, -jnp.inf)
        l_sc[...] = jnp.zeros_like(l_sc)
        acc_sc[...] = jnp.zeros_like(acc_sc)

    # ---- feature tile = ReLU(x @ W1 + b1)   (bf16 MXU, f32 accumulate) ----
    feat = jnp.dot(x_ref[...], w1_ref[...],
                   preferred_element_type=jnp.float32) + b1_ref[...]        # (TN, L) f32
    feat = jnp.maximum(feat, 0.0)
    # TODO(synk): GELU / Dropout(0.25) feature-head variants not emitted
    # (module constructed with act='relu', dropout=False).
    feat_bf = feat.astype(jnp.bfloat16)

    # ---- attention logits in row layout: a^T = wa2_row @ h^T -> (1, TN) ----
    h = jnp.tanh(jnp.dot(feat_bf, wa1_ref[...],
                         preferred_element_type=jnp.float32) + ba1_ref[...])  # (TN, D) f32
    a_row = jax.lax.dot_general(
        wa2_ref[...], h, (((1,), (1,)), ((), ())),
        preferred_element_type=jnp.float32) + ba2_ref[...]                    # (1, TN) f32

    # Mask padded instances of the last (partial) tile out of the softmax.
    col = i * tn + jax.lax.broadcasted_iota(jnp.int32, (1, tn), 1)
    a_row = jnp.where(col < n_ref[0], a_row, -jnp.inf)

    # ---- online softmax over the instance axis ----
    m_prev = m_sc[...]                                                        # (1, 1)
    m_new = jnp.maximum(m_prev, jnp.max(a_row, axis=-1, keepdims=True))
    alpha = jnp.exp(m_prev - m_new)                   # rescale of old accumulators
    p_row = jnp.exp(a_row - m_new)                                            # (1, TN)
    l_sc[...] = alpha * l_sc[...] + jnp.sum(p_row, axis=-1, keepdims=True)
    # Weighted feature sum rides the MXU: (1, TN) @ (TN, L).
    acc_sc[...] = alpha * acc_sc[...] + jnp.dot(
        p_row.astype(jnp.bfloat16), feat_bf, preferred_element_type=jnp.float32)
    m_sc[...] = m_new

    # ---- finalize: M = acc / l ;  logits = M @ Wc + bc ----
    @pl.when(i == pl.num_programs(0) - 1)
    def _():
        inv_l = pl.reciprocal(l_sc[...], approx=True)                         # EUP
        M = (acc_sc[...] * inv_l).astype(jnp.bfloat16)                        # (1, L)
        logits_ref[...] = jnp.dot(M, wc_ref[...],
                                  preferred_element_type=jnp.float32) + bc_ref[...]


def dattention_forward(x, params, *, tile_n=1024):
    """DAttention forward (return_attn=False) as one tiled Pallas call.

    tile_n: instance-tile size.  1024 keeps (x + feat + h) tiles, double
    buffered, well under v7x's 64 MiB VMEM; on v5e/v6e it can be raised to
    4096-8192 together with vmem_limit_bytes.
    """
    N, F = x.shape
    L = params["w1"].shape[1]
    D = params["wa1"].shape[1]
    C = params["wc"].shape[1]

    tile_n = _round_up(tile_n, 128)
    tn = min(tile_n, _round_up(N, 128))
    n_pad = _round_up(N, tn)
    num_tiles = n_pad // tn
    c_pad = _round_up(max(C, 1), 128)          # lane-dense logits slab

    # bf16 operands for the MXU; biases and all accumulation stay f32.
    x_bf = jnp.pad(x, ((0, n_pad - N), (0, 0))).astype(jnp.bfloat16)
    w1 = params["w1"].astype(jnp.bfloat16)
    wa1 = params["wa1"].astype(jnp.bfloat16)
    wc = jnp.pad(params["wc"], ((0, 0), (0, c_pad - C))).astype(jnp.bfloat16)
    bc = jnp.pad(params["bc"], ((0, 0), (0, c_pad - C)))
    wa2_row = params["wa2"].reshape(1, D)      # (1, D) f32 row

    n_valid = jnp.array([N], jnp.int32)        # scalar prefetch (SMEM)

    grid_spec = pltpu.PrefetchScalarGridSpec(
        num_scalar_prefetch=1,
        grid=(num_tiles,),
        in_specs=[
            pl.BlockSpec((tn, F), lambda i, n: (i, 0)),       # x: streamed per tile
            pl.BlockSpec((F, L), lambda i, n: (0, 0)),        # weights: VMEM-resident
            pl.BlockSpec((1, L), lambda i, n: (0, 0)),
            pl.BlockSpec((L, D), lambda i, n: (0, 0)),
            pl.BlockSpec((1, D), lambda i, n: (0, 0)),
            pl.BlockSpec((1, D), lambda i, n: (0, 0)),
            pl.BlockSpec((1, 1), lambda i, n: (0, 0)),
            pl.BlockSpec((L, c_pad), lambda i, n: (0, 0)),
            pl.BlockSpec((1, c_pad), lambda i, n: (0, 0)),
        ],
        out_specs=pl.BlockSpec((1, c_pad), lambda i, n: (0, 0)),
        scratch_shapes=[
            pltpu.VMEM((1, 1), jnp.float32),   # running max
            pltpu.VMEM((1, 1), jnp.float32),   # running softmax denominator
            pltpu.VMEM((1, L), jnp.float32),   # running weighted-feature sum
        ],
    )

    # TODO(synk): if batching multiple bags, add a leading bag grid axis marked
    # "parallel" so v7x can shard bags across its two TensorCores.
    logits_pad = pl.pallas_call(
        dattention_kernel,
        out_shape=jax.ShapeDtypeStruct((1, c_pad), jnp.float32),
        grid_spec=grid_spec,
        compiler_params=pltpu.CompilerParams(
            dimension_semantics=("arbitrary",),      # N axis carries the reduction
            vmem_limit_bytes=48 * 1024 * 1024,       # under v7x's 64 MiB physical
        ),
    )(n_valid, x_bf, w1, params["b1"], wa1, params["ba1"],
      wa2_row, params["ba2"], wc, bc)

    return logits_pad[:, :C]


def _init_params(key, n_features, L, D, n_classes):
    ks = jax.random.split(key, 8)
    s = 0.02
    return {
        "w1":  s * jax.random.normal(ks[0], (n_features, L), jnp.float32),
        "b1":  s * jax.random.normal(ks[1], (1, L), jnp.float32),
        "wa1": s * jax.random.normal(ks[2], (L, D), jnp.float32),
        "ba1": s * jax.random.normal(ks[3], (1, D), jnp.float32),
        "wa2": s * jax.random.normal(ks[4], (D, 1), jnp.float32),
        "ba2": s * jax.random.normal(ks[5], (1, 1), jnp.float32),
        "wc":  s * jax.random.normal(ks[6], (L, n_classes), jnp.float32),
        "bc":  s * jax.random.normal(ks[7], (1, n_classes), jnp.float32),
    }


def _reference(x, params):
    # Plain-JAX f32 replica of the PyTorch forward (act='relu', dropout off).
    feat = jnp.maximum(x @ params["w1"] + params["b1"], 0.0)       # (N, L)
    a = jnp.tanh(feat @ params["wa1"] + params["ba1"]) @ params["wa2"] + params["ba2"]
    a = jax.nn.softmax(a.T, axis=-1)                               # (1, N)
    M = a @ feat                                                   # (1, L)
    return M @ params["wc"] + params["bc"]                         # (1, C)


if __name__ == "__main__":
    key = jax.random.PRNGKey(0)
    # Small but non-trivial bag: N=300 with tile_n=128 -> 3 N-tiles, the last
    # one partial, so the online softmax + masking path is exercised.
    N, F, L, D, C = 300, 256, 512, 128, 2
    k_x, k_p = jax.random.split(key)
    params = _init_params(k_p, F, L, D, C)
    x = jax.random.normal(k_x, (N, F), jnp.float32)

    logits = dattention_forward(x, params, tile_n=128)
    jax.block_until_ready(logits)

    ref = _reference(x, params)
    assert logits.shape == (1, C), logits.shape
    # bf16 MXU inputs + approx reciprocal -> compare with a bf16-appropriate tolerance.
    assert jnp.allclose(logits, ref, atol=1e-2, rtol=2e-2), (logits, ref)
    print("KERNEL_OK")
</pallas_src>

<mosaic_0001>
module attributes {stable_mosaic.version = 11 : i64} {
  func.func @dattention_kernel(%arg0: i32, %arg1: memref<1xi32, #tpu.memory_space<smem>>, %arg2: memref<128x256xbf16, #tpu.memory_space<vmem>>, %arg3: memref<256x512xbf16, #tpu.memory_space<vmem>>, %arg4: memref<1x512xf32, #tpu.memory_space<vmem>>, %arg5: memref<512x128xbf16, #tpu.memory_space<vmem>>, %arg6: memref<1x128xf32, #tpu.memory_space<vmem>>, %arg7: memref<1x128xf32, #tpu.memory_space<vmem>>, %arg8: memref<1x1xf32, #tpu.memory_space<vmem>>, %arg9: memref<512x128xbf16, #tpu.memory_space<vmem>>, %arg10: memref<1x128xf32, #tpu.memory_space<vmem>>, %arg11: memref<1x128xf32, #tpu.memory_space<vmem>>, %arg12: memref<1x1xf32, #tpu.memory_space<vmem>>, %arg13: memref<1x1xf32, #tpu.memory_space<vmem>>, %arg14: memref<1x512xf32, #tpu.memory_space<vmem>>) attributes {dimension_semantics = [#tpu.dimension_semantics<arbitrary>], iteration_bounds = array<i64: 3>, scalar_prefetch = 1 : i64, scratch_operands = 3 : i64, tpu.core_type = #tpu.core_type<tc>, window_params = [{transform_indices = @transform_0, window_bounds = array<i64: 128, 256>}, {pipeline_mode = #tpu.pipeline_mode<synchronous>, transform_indices = @transform_1, window_bounds = array<i64: 256, 512>}, {pipeline_mode = #tpu.pipeline_mode<synchronous>, transform_indices = @transform_2, window_bounds = array<i64: 1, 512>}, {pipeline_mode = #tpu.pipeline_mode<synchronous>, transform_indices = @transform_3, window_bounds = array<i64: 512, 128>}, {pipeline_mode = #tpu.pipeline_mode<synchronous>, transform_indices = @transform_4, window_bounds = array<i64: 1, 128>}, {pipeline_mode = #tpu.pipeline_mode<synchronous>, transform_indices = @transform_5, window_bounds = array<i64: 1, 128>}, {pipeline_mode = #tpu.pipeline_mode<synchronous>, transform_indices = @transform_6, window_bounds = array<i64: 1, 1>}, {pipeline_mode = #tpu.pipeline_mode<synchronous>, transform_indices = @transform_7, window_bounds = array<i64: 512, 128>}, {pipeline_mode = #tpu.pipeline_mode<synchronous>, transform_indices = @transform_8, window_bounds = array<i64: 1, 128>}, {pipeline_mode = #tpu.pipeline_mode<synchronous>, transform_indices = @transform_9, window_bounds = array<i64: 1, 128>}]} {
    %c0_i32 = arith.constant 0 : i32
    %0 = arith.cmpi eq, %arg0, %c0_i32 : i32
    %1 = arith.extui %0 : i1 to i32
    %c0_i32_0 = arith.constant 0 : i32
    %2 = arith.cmpi ne, %1, %c0_i32_0 : i32
    scf.if %2 {
      %cst_35 = arith.constant 0xFF800000 : f32
      %58 = vector.broadcast %cst_35 : f32 to vector<1x1xf32>
      %c0_36 = arith.constant 0 : index
      %c0_37 = arith.constant 0 : index
      %59 = vector.load %arg12[%c0_36, %c0_37] : memref<1x1xf32, #tpu.memory_space<vmem>>, vector<1x1xf32>
      tpu.vector_store %arg12[%c0_36, %c0_37], %58 {strides = array<i32>} : memref<1x1xf32, #tpu.memory_space<vmem>>, vector<1x1xf32>,
      %cst_38 = arith.constant 0.000000e+00 : f32
      %60 = vector.broadcast %cst_38 : f32 to vector<1x1xf32>
      %c0_39 = arith.constant 0 : index
      %c0_40 = arith.constant 0 : index
      %61 = vector.load %arg13[%c0_39, %c0_40] : memref<1x1xf32, #tpu.memory_space<vmem>>, vector<1x1xf32>
      tpu.vector_store %arg13[%c0_39, %c0_40], %60 {strides = array<i32>} : memref<1x1xf32, #tpu.memory_space<vmem>>, vector<1x1xf32>,
      %cst_41 = arith.constant 0.000000e+00 : f32
      %62 = vector.broadcast %cst_41 : f32 to vector<1x512xf32>
      %c0_42 = arith.constant 0 : index
      %c0_43 = arith.constant 0 : index
      %63 = vector.load %arg14[%c0_42, %c0_43] : memref<1x512xf32, #tpu.memory_space<vmem>>, vector<1x512xf32>
      tpu.vector_store %arg14[%c0_42, %c0_43], %62 {strides = array<i32>} : memref<1x512xf32, #tpu.memory_space<vmem>>, vector<1x512xf32>,
    } else {
    }
    %c0 = arith.constant 0 : index
    %c0_1 = arith.constant 0 : index
    %3 = vector.load %arg2[%c0, %c0_1] : memref<128x256xbf16, #tpu.memory_space<vmem>>, vector<128x256xbf16>
    %c0_2 = arith.constant 0 : index
    %c0_3 = arith.constant 0 : index
    %4 = vector.load %arg3[%c0_2, %c0_3] : memref<256x512xbf16, #tpu.memory_space<vmem>>, vector<256x512xbf16>
    %cst = arith.constant dense<0.000000e+00> : vector<128x512xf32>
    %5 = tpu.matmul %3, %4, %cst {dimension_numbers = #tpu.dot_dimension_numbers<[1], [0], [0], [1], [0, 0, 1, 1], [], []>} : vector<128x256xbf16>, vector<256x512xbf16>, vector<128x512xf32> -> vector<128x512xf32>
    %c0_4 = arith.constant 0 : index
    %c0_5 = arith.constant 0 : index
    %6 = vector.load %arg4[%c0_4, %c0_5] : memref<1x512xf32, #tpu.memory_space<vmem>>, vector<1x512xf32>
    %7 = vector.broadcast %6 : vector<1x512xf32> to vector<128x512xf32>
    %8 = arith.addf %5, %7 : vector<128x512xf32>
    %cst_6 = arith.constant 0.000000e+00 : f32
    %9 = vector.broadcast %cst_6 : f32 to vector<128x512xf32>
    %10 = arith.maximumf %8, %9 : vector<128x512xf32>
    %11 = arith.truncf %10 : vector<128x512xf32> to vector<128x512xbf16>
    %c0_7 = arith.constant 0 : index
    %c0_8 = arith.constant 0 : index
    %12 = vector.load %arg5[%c0_7, %c0_8] : memref<512x128xbf16, #tpu.memory_space<vmem>>, vector<512x128xbf16>
    %cst_9 = arith.constant dense<0.000000e+00> : vector<128x128xf32>
    %13 = tpu.matmul %11, %12, %cst_9 {dimension_numbers = #tpu.dot_dimension_numbers<[1], [0], [0], [1], [0, 0, 1, 1], [], []>} : vector<128x512xbf16>, vector<512x128xbf16>, vector<128x128xf32> -> vector<128x128xf32>
    %c0_10 = arith.constant 0 : index
    %c0_11 = arith.constant 0 : index
    %14 = vector.load %arg6[%c0_10, %c0_11] : memref<1x128xf32, #tpu.memory_space<vmem>>, vector<1x128xf32>
    %15 = vector.broadcast %14 : vector<1x128xf32> to vector<128x128xf32>
    %16 = arith.addf %13, %15 : vector<128x128xf32>
    %17 = math.tanh %16 : vector<128x128xf32>
    %c0_12 = arith.constant 0 : index
    %c0_13 = arith.constant 0 : index
    %18 = vector.load %arg7[%c0_12, %c0_13] : memref<1x128xf32, #tpu.memory_space<vmem>>, vector<1x128xf32>
    %cst_14 = arith.constant dense<0.000000e+00> : vector<1x128xf32>
    %19 = tpu.matmul %18, %17, %cst_14 {dimension_numbers = #tpu.dot_dimension_numbers<[1], [1], [0], [0], [0, 0, 1, 0], [], []>} : vector<1x128xf32>, vector<128x128xf32>, vector<1x128xf32> -> vector<1x128xf32>
    %c0_15 = arith.constant 0 : index
    %c0_16 = arith.constant 0 : index
    %20 = vector.load %arg8[%c0_15, %c0_16] : memref<1x1xf32, #tpu.memory_space<vmem>>, vector<1x1xf32>
    %21 = vector.broadcast %20 : vector<1x1xf32> to vector<1x128xf32>
    %22 = arith.addf %19, %21 : vector<1x128xf32>
    %c128_i32 = arith.constant 128 : i32
    %23 = arith.muli %arg0, %c128_i32 : i32
    %24 = tpu.iota {dimensions = array<i32: 1>} : vector<1x128xi32>
    %25 = vector.broadcast %23 : i32 to vector<1x128xi32>
    %26 = arith.addi %25, %24 : vector<1x128xi32>
    %c0_17 = arith.constant 0 : index
    %27 = memref.load %arg1[%c0_17] : memref<1xi32, #tpu.memory_space<smem>>
    %28 = vector.broadcast %27 : i32 to vector<1x128xi32>
    %29 = arith.cmpi slt, %26, %28 : vector<1x128xi32>
    %cst_18 = arith.constant 0xFF800000 : f32
    %30 = vector.broadcast %cst_18 : f32 to vector<1x128xf32>
    %31 = arith.select %29, %22, %30 : vector<1x128xi1>, vector<1x128xf32>
    %c0_19 = arith.constant 0 : index
    %c0_20 = arith.constant 0 : index
    %32 = vector.load %arg12[%c0_19, %c0_20] : memref<1x1xf32, #tpu.memory_space<vmem>>, vector<1x1xf32>
    %cst_21 = arith.constant dense<0xFF800000> : vector<1xf32>
    %33 = vector.multi_reduction <maximumf>, %31, %cst_21 [1] : vector<1x128xf32> to vector<1xf32>
    %34 = vector.shape_cast %33 : vector<1xf32> to vector<1x1xf32>
    %35 = arith.maximumf %32, %34 : vector<1x1xf32>
    %36 = arith.subf %32, %35 : vector<1x1xf32>
    %37 = math.exp %36 : vector<1x1xf32>
    %38 = vector.broadcast %35 : vector<1x1xf32> to vector<1x128xf32>
    %39 = arith.subf %31, %38 : vector<1x128xf32>
    %40 = math.exp %39 : vector<1x128xf32>
    %c0_22 = arith.constant 0 : index
    %c0_23 = arith.constant 0 : index
    %41 = vector.load %arg13[%c0_22, %c0_23] : memref<1x1xf32, #tpu.memory_space<vmem>>, vector<1x1xf32>
    %42 = arith.mulf %37, %41 : vector<1x1xf32>
    %cst_24 = arith.constant dense<0.000000e+00> : vector<1xf32>
    %43 = vector.multi_reduction <add>, %40, %cst_24 [1] : vector<1x128xf32> to vector<1xf32>
    %44 = vector.shape_cast %43 : vector<1xf32> to vector<1x1xf32>
    %45 = arith.addf %42, %44 : vector<1x1xf32>
    %c0_25 = arith.constant 0 : index
    %c0_26 = arith.constant 0 : index
    %46 = vector.load %arg13[%c0_25, %c0_26] : memref<1x1xf32, #tpu.memory_space<vmem>>, vector<1x1xf32>
    tpu.vector_store %arg13[%c0_25, %c0_26], %45 {strides = array<i32>} : memref<1x1xf32, #tpu.memory_space<vmem>>, vector<1x1xf32>,
    %c0_27 = arith.constant 0 : index
    %c0_28 = arith.constant 0 : index
    %47 = vector.load %arg14[%c0_27, %c0_28] : memref<1x512xf32, #tpu.memory_space<vmem>>, vector<1x512xf32>
    %48 = vector.broadcast %37 : vector<1x1xf32> to vector<1x512xf32>
    %49 = arith.mulf %48, %47 : vector<1x512xf32>
    %50 = arith.truncf %40 : vector<1x128xf32> to vector<1x128xbf16>
    %cst_29 = arith.constant dense<0.000000e+00> : vector<1x512xf32>
    %51 = tpu.matmul %50, %11, %cst_29 {dimension_numbers = #tpu.dot_dimension_numbers<[1], [0], [0], [1], [0, 0, 1, 1], [], []>} : vector<1x128xbf16>, vector<128x512xbf16>, vector<1x512xf32> -> vector<1x512xf32>
    %52 = arith.addf %49, %51 : vector<1x512xf32>
    %c0_30 = arith.constant 0 : index
    %c0_31 = arith.constant 0 : index
    %53 = vector.load %arg14[%c0_30, %c0_31] : memref<1x512xf32, #tpu.memory_space<vmem>>, vector<1x512xf32>
    tpu.vector_store %arg14[%c0_30, %c0_31], %52 {strides = array<i32>} : memref<1x512xf32, #tpu.memory_space<vmem>>, vector<1x512xf32>,
    %c0_32 = arith.constant 0 : index
    %c0_33 = arith.constant 0 : index
    %54 = vector.load %arg12[%c0_32, %c0_33] : memref<1x1xf32, #tpu.memory_space<vmem>>, vector<1x1xf32>
    tpu.vector_store %arg12[%c0_32, %c0_33], %35 {strides = array<i32>} : memref<1x1xf32, #tpu.memory_space<vmem>>, vector<1x1xf32>,
    %c2_i32 = arith.constant 2 : i32
    %55 = arith.cmpi eq, %arg0, %c2_i32 : i32
    %56 = arith.extui %55 : i1 to i32
    %c0_i32_34 = arith.constant 0 : i32
    %57 = arith.cmpi ne, %56, %c0_i32_34 : i32
    scf.if %57 {
      %c0_35 = arith.constant 0 : index
      %c0_36 = arith.constant 0 : index
      %58 = vector.load %arg13[%c0_35, %c0_36] : memref<1x1xf32, #tpu.memory_space<vmem>>, vector<1x1xf32>
      %59 = tpu.reciprocal %58 {approx = true} : vector<1x1xf32> -> vector<1x1xf32>
      %c0_37 = arith.constant 0 : index
      %c0_38 = arith.constant 0 : index
      %60 = vector.load %arg14[%c0_37, %c0_38] : memref<1x512xf32, #tpu.memory_space<vmem>>, vector<1x512xf32>
      %61 = vector.broadcast %59 : vector<1x1xf32> to vector<1x512xf32>
      %62 = arith.mulf %60, %61 : vector<1x512xf32>
      %63 = arith.truncf %62 : vector<1x512xf32> to vector<1x512xbf16>
      %c0_39 = arith.constant 0 : index
      %c0_40 = arith.constant 0 : index
      %64 = vector.load %arg9[%c0_39, %c0_40] : memref<512x128xbf16, #tpu.memory_space<vmem>>, vector<512x128xbf16>
      %cst_41 = arith.constant dense<0.000000e+00> : vector<1x128xf32>
      %65 = tpu.matmul %63, %64, %cst_41 {dimension_numbers = #tpu.dot_dimension_numbers<[1], [0], [0], [1], [0, 0, 1, 1], [], []>} : vector<1x512xbf16>, vector<512x128xbf16>, vector<1x128xf32> -> vector<1x128xf32>
      %c0_42 = arith.constant 0 : index
      %c0_43 = arith.constant 0 : index
      %66 = vector.load %arg10[%c0_42, %c0_43] : memref<1x128xf32, #tpu.memory_space<vmem>>, vector<1x128xf32>
      %67 = arith.addf %65, %66 : vector<1x128xf32>
      %c0_44 = arith.constant 0 : index
      %c0_45 = arith.constant 0 : index
      %68 = vector.load %arg11[%c0_44, %c0_45] : memref<1x128xf32, #tpu.memory_space<vmem>>, vector<1x128xf32>
      tpu.vector_store %arg11[%c0_44, %c0_45], %67 {strides = array<i32>} : memref<1x128xf32, #tpu.memory_space<vmem>>, vector<1x128xf32>,
    } else {
    }
    return
  }
  func.func @transform_0(%arg0: i32, %arg1: memref<1xi32, #tpu.memory_space<smem>>) -> (i32, i32) {
    %c0_i32 = arith.constant 0 : i32
    %c0_i32_0 = arith.constant 0 : i32
    return %arg0, %c0_i32 : i32, i32
  }
  func.func @transform_1(%arg0: i32, %arg1: memref<1xi32, #tpu.memory_space<smem>>) -> (i32, i32) {
    %c0_i32 = arith.constant 0 : i32
    %c0_i32_0 = arith.constant 0 : i32
    %c0_i32_1 = arith.constant 0 : i32
    return %c0_i32, %c0_i32_0 : i32, i32
  }
  func.func @transform_2(%arg0: i32, %arg1: memref<1xi32, #tpu.memory_space<smem>>) -> (i32, i32) {
    %c0_i32 = arith.constant 0 : i32
    %c0_i32_0 = arith.constant 0 : i32
    %c0_i32_1 = arith.constant 0 : i32
    return %c0_i32, %c0_i32_0 : i32, i32
  }
  func.func @transform_3(%arg0: i32, %arg1: memref<1xi32, #tpu.memory_space<smem>>) -> (i32, i32) {
    %c0_i32 = arith.constant 0 : i32
    %c0_i32_0 = arith.constant 0 : i32
    %c0_i32_1 = arith.constant 0 : i32
    return %c0_i32, %c0_i32_0 : i32, i32
  }
  func.func @transform_4(%arg0: i32, %arg1: memref<1xi32, #tpu.memory_space<smem>>) -> (i32, i32) {
    %c0_i32 = arith.constant 0 : i32
    %c0_i32_0 = arith.constant 0 : i32
    %c0_i32_1 = arith.constant 0 : i32
    return %c0_i32, %c0_i32_0 : i32, i32
  }
  func.func @transform_5(%arg0: i32, %arg1: memref<1xi32, #tpu.memory_space<smem>>) -> (i32, i32) {
    %c0_i32 = arith.constant 0 : i32
    %c0_i32_0 = arith.constant 0 : i32
    %c0_i32_1 = arith.constant 0 : i32
    return %c0_i32, %c0_i32_0 : i32, i32
  }
  func.func @transform_6(%arg0: i32, %arg1: memref<1xi32, #tpu.memory_space<smem>>) -> (i32, i32) {
    %c0_i32 = arith.constant 0 : i32
    %c0_i32_0 = arith.constant 0 : i32
    %c0_i32_1 = arith.constant 0 : i32
    return %c0_i32, %c0_i32_0 : i32, i32
  }
  func.func @transform_7(%arg0: i32, %arg1: memref<1xi32, #tpu.memory_space<smem>>) -> (i32, i32) {
    %c0_i32 = arith.constant 0 : i32
    %c0_i32_0 = arith.constant 0 : i32
    %c0_i32_1 = arith.constant 0 : i32
    return %c0_i32, %c0_i32_0 : i32, i32
  }
  func.func @transform_8(%arg0: i32, %arg1: memref<1xi32, #tpu.memory_space<smem>>) -> (i32, i32) {
    %c0_i32 = arith.constant 0 : i32
    %c0_i32_0 = arith.constant 0 : i32
    %c0_i32_1 = arith.constant 0 : i32
    return %c0_i32, %c0_i32_0 : i32, i32
  }
  func.func @transform_9(%arg0: i32, %arg1: memref<1xi32, #tpu.memory_space<smem>>) -> (i32, i32) {
    %c0_i32 = arith.constant 0 : i32
    %c0_i32_0 = arith.constant 0 : i32
    %c0_i32_1 = arith.constant 0 : i32
    return %c0_i32, %c0_i32_0 : i32, i32
  }
}

</mosaic_0001>

<bundles_post_ra>
// kernel: tpu_custom_call.1
= control target key start
LH: loop header
LB: loop body
LE: loop exit
PB: predicated region body
PF: predicated region fallthrough
CT: control target
= control target key end

     0   :  { %s4133_s0 = inlined_call_operand.<no memory space> [shape: s32[1], index: 0, kind: input, shape index: {}]   ;;  %s4134_s1 = inlined_call_operand.hbm [shape: bf16[384,256], index: 1, kind: input, shape index: {}]   ;;  %s4135_s2 = inlined_call_operand.hbm [shape: bf16[256,512], index: 2, kind: input, shape index: {}]   ;;  %s4136_s3 = inlined_call_operand.vmem [shape: f32[1,512], index: 3, kind: input, shape index: {}]   ;;  %s4137_s4 = inlined_call_operand.hbm [shape: bf16[512,128], index: 4, kind: input, shape index: {}]   ;;  %s4138_s5 = inlined_call_operand.vmem [shape: f32[1,128], index: 5, kind: input, shape index: {}]   ;;  %s4139_s6 = inlined_call_operand.vmem [shape: f32[1,128], index: 6, kind: input, shape index: {}]   ;;  %s4140_s7 = inlined_call_operand.<no memory space> [shape: f32[1,1], index: 7, kind: input, shape index: {}]   ;;  %s4141_s8 = inlined_call_operand.hbm [shape: bf16[512,128], index: 8, kind: input, shape index: {}]   ;;  %s4142_s9 = inlined_call_operand.vmem [shape: f32[1,128], index: 9, kind: input, shape index: {}]   ;;  %s4143_s10 = inlined_call_operand.hbm [shape: f32[1,128], index: 10, kind: output, shape index: {}]  }
   0x1   :  { %15 = sst [smem:[#allocation6]] %s4133_s0  ;;  %v16_v0 = vstv %s4140_s7 }
   0x2   :  { %17 = vst [vmem:[#allocation7] sm:$0x1] %v16_v0 }
   0x3   :  { %18 = vsyncpa [#allocation9], 0 }
   0x4   :  { %20 = vsyncpa [#allocation9 + $0x1], 0 }
   0x5   :  { %21 = vsyncpa [#allocation12], 0 }
   0x6   :  { %22 = vsyncpa [#allocation15], 0 }
   0x7   :  { %23 = vsyncpa [#allocation10], 0  ;;  %s3572_s17 = smov 0   ;;  %s3574_s18 = smov 0  }
   0x8   :  { %s3576_s19 = smov 0   ;;  %s3578_s20 = smov 0  }
   0x9 LB: > { %s3591_s0 = sadd.s32 4294967295, %s3495_s20   ;;  %p49_p0 = scmp.ne.s32.totalorder %s3487_s18, %s3483_s17  ;;  %s3495_s20 = sphi %s3578_s20, %s4151_s20   ;;  %s3491_s19 = sphi %s3576_s19, %s4150_s19   ;;  %s3487_s18 = sphi %s3574_s18, %s4149_s18   ;;  %s3483_s17 = sphi %s3572_s17, %s4148_s17  }
   0xa   : > { %p50_p1 = scmp.eq.s32.totalorder %s3591_s0, 0  ;;  %p2429_p2 = scmp.ge.s32.totalorder %s3495_s20, 1 }
   0xb   : > { %p249_p3 = scmp.lt.s32.totalorder %s3495_s20, 4  ;;  %p2430_p4 = scmp.ne.s32.totalorder %s3591_s0, 0 }
   0xc   : > { %p3600_p5 = por %p50_p1, %p49_p0  ;;  %s260_s23 = sshll.u32 %s4135_s2, 4  ;;  %s261_s23 = int_to_ptr.hbm [resolvable:$true] %s260_s23 }
   0xd   : > { %p3607_p6 = pnand %p2429_p2, %p249_p3  ;;  %s3497_s25 = smov [#allocation11]  }
   0xe   : > { %s262_s26 = sshll.u32 %s3497_s25, 4  ;;  %s277_s30 = sshll.u32 %s4137_s4, 4  ;;  %s263_s26 = int_to_ptr.vmem [resolvable:$true] %s262_s26  ;;  %s278_s30 = int_to_ptr.hbm [resolvable:$true] %s277_s30 }
   0xf   : > { %p3190_p7 = pneg %p3607_p6  ;;  %s3498_s11 = smov 256  }
  0x10   : > { %s3499_s12 = smov 16   ;;  %s3500_s13 = smov [#allocation13]  }
  0x11   : > { %p3615_p8 = pnand %p3190_p7, %p50_p1  ;;  %s279_s14 = sshll.u32 %s3500_s13, 4  ;;  %s280_s14 = int_to_ptr.vmem [resolvable:$true] %s279_s14 }
  0x12   : > { %s3501_s15 = smov 64   ;;  %s3502_s16 = smov 4  }
  0x13   : > { %3193 = dma.hbm_to_vmem [thread:$0]  (!%p3615_p8), %s261_s23, 8192, %s263_s26, [#allocation12], %s3498_s11, %s3498_s11, %s3499_s12  }
  0x14   : > { %3196 = dma.hbm_to_vmem [thread:$0]  (!%p3615_p8), %s278_s30, 4096, %s280_s14, [#allocation12], %s3501_s15, %s3501_s15, %s3502_s16  }
  0x15   : > { %s300_s22 = sshll.u32 %s4141_s8, 4  ;;  %s3503_s23 = smov [#allocation14]   ;;  %s301_s22 = int_to_ptr.hbm [resolvable:$true] %s300_s22 }
  0x16   : > { %s302_s25 = sshll.u32 %s3503_s23, 4  ;;  %s3632_s26 = sadd.s32 1, %s3495_s20   ;;  %s303_s25 = int_to_ptr.vmem [resolvable:$true] %s302_s25 }
  0x17   : > { %3199 = dma.hbm_to_vmem [thread:$0]  (!%p3615_p8), %s301_s22, 4096, %s303_s25, [#allocation15], %s3501_s15, %s3501_s15, %s3502_s16  }
  0x18   : > { %s33_s28 = ssub.s32 %s3495_s20, %s3632_s26  ;;  %s36_s29 = sadd.s32 1, %s3491_s19 }
  0x19   : > { %p34_p9 = scmp.eq.s32.totalorder %s33_s28, 0  ;;  %p43_p10 = scmp.ne.s32.totalorder %s3491_s19, %s3487_s18 }
  0x1a   : > { %p44_p11 = scmp.eq.s32.totalorder %s3495_s20, 0  ;;  %p3207_p12 = scmp.lt.s32.totalorder %s3495_s20, 3 }
  0x1b   : > { %s3642_s30 = scalar_select %p34_p9, %s3491_s19, %s36_s29  }
  0x1c   : > { %p45_p13 = por %p44_p11, %p43_p10  ;;  %s319_s11 = sand.u32 1, %s3491_s19  }
  0x1d   : > { %s2434_s12 = sshll.u32 %s319_s11, 7  ;;  %s3027_s13 = sshll.u32 %s3495_s20, 7 }
  0x1e   : > { %s329_s27 = scalar_lea.hbm %s4134_s1, %s3027_s13  ;;  %s323_s15 = scalar_lea.vmem [#allocation8], %s2434_s12 }
  0x1f   : > { %s332_s16 = sshll.u32 %s323_s15, 4  ;;  %s330_s21 = sshll.u32 %s329_s27, 4  ;;  %s333_s16 = int_to_ptr.vmem [resolvable:$true] %s332_s16  ;;  %s331_s21 = int_to_ptr.hbm [resolvable:$true] %s330_s21 }
  0x20   : > { %p3649_p0 = pnand %p3207_p12, %p45_p13  ;;  %s320_s23 = scalar_lea.sflag [#allocation9], %s319_s11 }
  0x21   : > { %s3391_s25 = sshra.s32 %s331_s21, 4  ;;  %s3398_s12 = scalar_lea.hbm %s4134_s1, 384  ;;  %s3392_s25 = int_to_ptr.hbm [resolvable:$true] %s3391_s25 }
  0x22   : > { %s3393_s28 = scalar_lea.hbm %s3392_s25, 128  ;;  %p3395_p3 = pneg %p3649_p0 }
  0x23   : > { %p3394_p2 = scmp.ne.s32.totalorder %s3392_s25, %s3393_s28  ;;  %p3399_p9 = scmp.lt.s32.totalorder %s3392_s25, %s4134_s1 }
  0x24   : > { %p3400_p10 = scmp.lt.s32.totalorder %s3398_s12, %s3393_s28 }
  0x25   : > { %p3396_p7 = pnand %p3395_p3, %p3394_p2 }
  0x26   : > { %p3401_p11 = por %p3400_p10, %p3399_p9 }
  0x27   : > { %p3397_p8 = pneg %p3396_p7 }
  0x29   : > { %p3402_p12 = pnand %p3401_p11, %p3397_p8 }
  0x2b   : > { %3405 = shalt.err (!%p3402_p12)
}
  0x2c   : > { %s3504_s11 = smov 128   ;;  %s3505_s17 = smov 8  }
  0x2d   : > { %3203 = dma.hbm_to_vmem [thread:$0]  (!%p3649_p0), %s331_s21, 2048, %s333_s16, %s320_s23, %s3504_s11, %s3504_s11, %s3505_s17  }
  0x2e   : > { %344 = sbr.rel (%p3607_p6) target bundleno = 1496 (0x5d8), region = 56  ;;  %s346_s27 = sand.u32 (!%p3607_p6), 1, %s3487_s18  }
  0x2f   : > { %s2439_s15 = sshll.u32 (!%p3607_p6), %s346_s27, 7  ;;  %s347_s20 = scalar_lea.sflag (!%p3607_p6), [#allocation9], %s346_s27 }
  0x30   : > { %s3666_s29 = scalar_lea.vmem (!%p3607_p6), [#allocation8], %s2439_s15 }
  0x33   : > { %3466 = dma.done.wait (%p3600_p5), %s347_s20, 2048  }
  0x34   : > { %3468 = vsyncadd (%p3600_p5), %s347_s20, 4294965248 }
  0x35   : > { %3470 = dma.done.wait (%p50_p1), [#allocation12], 12288  }
  0x36   : > { %3472 = vsyncadd (%p50_p1), [#allocation12], 4294955008 }
  0x37   : > { %3474 = dma.done.wait (%p50_p1), [#allocation15], 4096  }
  0x38   : > { %3476 = vsyncadd (%p50_p1), [#allocation15], 4294963200  ;;  %400 = sbr.rel (%p2430_p4) target bundleno = 65 (0x41), region = 76 }
  0x3d   : > { %vm401_vm0 = vcmask 0   ;;  %v404_v1 = vlaneseq  ;;  %v3506_v2 = vmov -inf   ;;  %v3507_v3 = vmov 0.0  }
  0x3e   : > { %402 = vst.msk [vmem:[#allocation2] sm:$0x1] %vm401_vm0, %v3506_v2 }
  0x3f   : > { %403 = vst.msk [vmem:[#allocation3] sm:$0x1] %vm401_vm0, %v3507_v3  ;;  %vm406_vm1 = vcmp.lt.s32.totalorder %v404_v1, 512 }
  0x40   : > { %408 = vst.msk [vmem:[#allocation4] sm:$0xf] %vm406_vm1, %v3507_v3 }
  0x41 PF: > { %v2622_v4 = vld [vmem:[#allocation11 + $0xe0] sm:$0xf]  ;;  %v3074_v5 = vld [vmem:[#allocation11 + $0xec] sm:$0xf0]  ;;  %v3072_v9 = vld [vmem:[#allocation11 + $0xe4] sm:$0xf] }
  0x42   : > { %v2750_v6 = vld [vmem:[#allocation11 + $0x1e0] sm:$0xf]  ;;  %v2623_v7 = vor.u32 %v3074_v5, %v2622_v4  ;;  %v3106_v8 = vld [vmem:[#allocation11 + $0x1ec] sm:$0xf0]  ;;  %v2624_v10 = vld [vmem:[#allocation11 + $0xf0] sm:$0xf0] }
  0x43   : > { %v2751_v11 = vor.u32 %v3106_v8, %v2750_v6  ;;  %v2627_v12 = vor.u32 %v3072_v9, %v2624_v10  ;;  %v3104_v13 = vld [vmem:[#allocation11 + $0x1e4] sm:$0xf]  ;;  %v2752_v14 = vld [vmem:[#allocation11 + $0x1f0] sm:$0xf0]  ;;  %v2606_v15 = vld [vmem:[#allocation11 + $0xc0] sm:$0xf] }
  0x44   : > { %899 = vmatpush.bf16.msra.mxu0 %v2623_v7  ;;  %v2755_v16 = vor.u32 %v3104_v13, %v2752_v14  ;;  %v3070_v17 = vld [vmem:[#allocation11 + $0xcc] sm:$0xf0]  ;;  %v2734_v18 = vld [vmem:[#allocation11 + $0x1c0] sm:$0xf]  ;;  %v3068_v22 = vld [vmem:[#allocation11 + $0xc4] sm:$0xf] }
  0x45   : > { %v3102_v19 = vld [vmem:[#allocation11 + $0x1cc] sm:$0xf0]  ;;  %948 = vmatpush.bf16.msra.mxu1 %v2751_v11  ;;  %997 = vmatpush.bf16.msra.mxu2 %v2627_v12  ;;  %v2607_v20 = vor.u32 %v3070_v17, %v2606_v15  ;;  %v2608_v23 = vld [vmem:[#allocation11 + $0xd0] sm:$0xf0]  ;;  %v3100_v24 = vld [vmem:[#allocation11 + $0x1c4] sm:$0xf] }
  0x46   : > { %v2735_v21 = vor.u32 %v3102_v19, %v2734_v18  ;;  %1046 = vmatpush.bf16.msra.mxu3 %v2755_v16  ;;  %v2611_v25 = vor.u32 %v3068_v22, %v2608_v23  ;;  %v2736_v26 = vld [vmem:[#allocation11 + $0x1d0] sm:$0xf0]  ;;  %v2590_v27 = vld [vmem:[#allocation11 + $0xa0] sm:$0xf]  ;;  %v3066_v28 = vld [vmem:[#allocation11 + $0xac] sm:$0xf0] }
  0x47   : > { %v2739_v29 = vor.u32 %v3100_v24, %v2736_v26  ;;  %v2718_v30 = vld [vmem:[#allocation11 + $0x1a0] sm:$0xf]  ;;  %v3098_v31 = vld [vmem:[#allocation11 + $0x1ac] sm:$0xf0]  ;;  %v3064_v32 = vld [vmem:[#allocation11 + $0xa4] sm:$0xf]  ;;  %v2591_v33 = vor.u32 %v3066_v28, %v2590_v27 }
  0x48   : > { %900 = vmatpush.bf16.msra.mxu0 %v2607_v20  ;;  %v2592_v34 = vld [vmem:[#allocation11 + $0xb0] sm:$0xf0]  ;;  %v3096_v35 = vld [vmem:[#allocation11 + $0x1a4] sm:$0xf]  ;;  %v2719_v37 = vor.u32 %v3098_v31, %v2718_v30  ;;  %v2574_v39 = vld [vmem:[#allocation11 + $0x80] sm:$0xf] }
  0x49   : > { %v2720_v36 = vld [vmem:[#allocation11 + $0x1b0] sm:$0xf0]  ;;  %949 = vmatpush.bf16.msra.mxu1 %v2735_v21  ;;  %998 = vmatpush.bf16.msra.mxu2 %v2611_v25  ;;  %v2595_v38 = vor.u32 %v3064_v32, %v2592_v34  ;;  %v3062_v40 = vld [vmem:[#allocation11 + $0x8c] sm:$0xf0]  ;;  %v2702_v41 = vld [vmem:[#allocation11 + $0x180] sm:$0xf] }
  0x4a   : > { %1047 = vmatpush.bf16.msra.mxu3 %v2739_v29  ;;  %v2723_v42 = vor.u32 %v3096_v35, %v2720_v36  ;;  %v3094_v43 = vld [vmem:[#allocation11 + $0x18c] sm:$0xf0]  ;;  %v3060_v44 = vld [vmem:[#allocation11 + $0x84] sm:$0xf]  ;;  %v2576_v45 = vld [vmem:[#allocation11 + $0x90] sm:$0xf0]  ;;  %v2575_v48 = vor.u32 %v3062_v40, %v2574_v39 }
  0x4b   : > { %v3092_v46 = vld [vmem:[#allocation11 + $0x184] sm:$0xf]  ;;  %v2704_v47 = vld [vmem:[#allocation11 + $0x190] sm:$0xf0]  ;;  %v2703_v49 = vor.u32 %v3094_v43, %v2702_v41  ;;  %v2579_v50 = vor.u32 %v3060_v44, %v2576_v45  ;;  %v2558_v51 = vld [vmem:[#allocation11 + $0x60] sm:$0xf] }
  0x4c   : > { %901 = vmatpush.bf16.msra.mxu0 %v2591_v33  ;;  %v3058_v52 = vld [vmem:[#allocation11 + $0x6c] sm:$0xf0]  ;;  %v2686_v53 = vld [vmem:[#allocation11 + $0x160] sm:$0xf]  ;;  %v2707_v54 = vor.u32 %v3092_v46, %v2704_v47  ;;  %v3056_v56 = vld [vmem:[#allocation11 + $0x64] sm:$0xf] }
  0x4d   : > { %950 = vmatpush.bf16.msra.mxu1 %v2719_v37  ;;  %999 = vmatpush.bf16.msra.mxu2 %v2595_v38  ;;  %v3090_v55 = vld [vmem:[#allocation11 + $0x16c] sm:$0xf0]  ;;  %v2560_v57 = vld [vmem:[#allocation11 + $0x70] sm:$0xf0]  ;;  %v3088_v58 = vld [vmem:[#allocation11 + $0x164] sm:$0xf]  ;;  %v2559_v60 = vor.u32 %v3058_v52, %v2558_v51 }
  0x4e   : > { %1048 = vmatpush.bf16.msra.mxu3 %v2723_v42  ;;  %v2688_v59 = vld [vmem:[#allocation11 + $0x170] sm:$0xf0]  ;;  %v2687_v61 = vor.u32 %v3090_v55, %v2686_v53  ;;  %v2563_v62 = vor.u32 %v3056_v56, %v2560_v57  ;;  %v2542_v63 = vld [vmem:[#allocation11 + $0x40] sm:$0xf]  ;;  %v3054_v0 = vld [vmem:[#allocation11 + $0x4c] sm:$0xf0] }
  0x4f   : > { %v2670_v1 = vld [vmem:[#allocation11 + $0x140] sm:$0xf]  ;;  %v2691_v2 = vor.u32 %v3088_v58, %v2688_v59  ;;  %v3086_v3 = vld [vmem:[#allocation11 + $0x14c] sm:$0xf0]  ;;  %v3052_v4 = vld [vmem:[#allocation11 + $0x44] sm:$0xf]  ;;  %v2543_v8 = vor.u32 %v3054_v0, %v2542_v63 }
  0x50   : > { %902 = vmatpush.bf16.msra.mxu0 %v2575_v48  ;;  %v2544_v5 = vld [vmem:[#allocation11 + $0x50] sm:$0xf0]  ;;  %v3084_v6 = vld [vmem:[#allocation11 + $0x144] sm:$0xf]  ;;  %v2671_v9 = vor.u32 %v3086_v3, %v2670_v1  ;;  %v2526_v11 = vld [vmem:[#allocation11 + $0x20] sm:$0xf] }
  0x51   : > { %951 = vmatpush.bf16.msra.mxu1 %v2703_v49  ;;  %1000 = vmatpush.bf16.msra.mxu2 %v2579_v50  ;;  %v2672_v7 = vld [vmem:[#allocation11 + $0x150] sm:$0xf0]  ;;  %v2547_v10 = vor.u32 %v3052_v4, %v2544_v5  ;;  %v3050_v12 = vld [vmem:[#allocation11 + $0x2c] sm:$0xf0]  ;;  %v2654_v13 = vld [vmem:[#allocation11 + $0x120] sm:$0xf] }
  0x52   : > { %1049 = vmatpush.bf16.msra.mxu3 %v2707_v54  ;;  %v2675_v14 = vor.u32 %v3084_v6, %v2672_v7  ;;  %v3082_v15 = vld [vmem:[#allocation11 + $0x12c] sm:$0xf0]  ;;  %v3048_v16 = vld [vmem:[#allocation11 + $0x24] sm:$0xf]  ;;  %v2528_v17 = vld [vmem:[#allocation11 + $0x30] sm:$0xf0]  ;;  %v2527_v20 = vor.u32 %v3050_v12, %v2526_v11 }
  0x53   : > { %v3080_v18 = vld [vmem:[#allocation11 + $0x124] sm:$0xf]  ;;  %v2656_v19 = vld [vmem:[#allocation11 + $0x130] sm:$0xf0]  ;;  %v2510_v21 = vld [vmem:[#allocation11] sm:$0xf]  ;;  %v2655_v22 = vor.u32 %v3082_v15, %v2654_v13  ;;  %v2531_v23 = vor.u32 %v3048_v16, %v2528_v17 }
  0x54   : > { %903 = vmatpush.bf16.msra.mxu0 %v2559_v60  ;;  %v3046_v24 = vld [vmem:[#allocation11 + $0xc] sm:$0xf0]  ;;  %v2638_v25 = vld [vmem:[#allocation11 + $0x100] sm:$0xf]  ;;  %v2659_v26 = vor.u32 %v3080_v18, %v2656_v19  ;;  %v3044_v28 = vld [vmem:[#allocation11 + $0x4] sm:$0xf] }
  0x55   : > { %952 = vmatpush.bf16.msra.mxu1 %v2687_v61  ;;  %1001 = vmatpush.bf16.msra.mxu2 %v2563_v62  ;;  %v3078_v27 = vld [vmem:[#allocation11 + $0x10c] sm:$0xf0]  ;;  %v2512_v29 = vld [vmem:[#allocation11 + $0x10] sm:$0xf0]  ;;  %v3076_v30 = vld [vmem:[#allocation11 + $0x104] sm:$0xf]  ;;  %v2511_v32 = vor.u32 %v3046_v24, %v2510_v21 }
  0x56   : > { %1050 = vmatpush.bf16.msra.mxu3 %v2691_v2  ;;  %v2640_v31 = vld [vmem:[#allocation11 + $0x110] sm:$0xf0]  ;;  %v2446_v33 = vld [vmem:[%s3666_s29] sm:$0xf]  ;;  %v3029_v34 = vld [vmem:[%s3666_s29 + $0x4] sm:$0xf0]  ;;  %v2639_v35 = vor.u32 %v3078_v27, %v2638_v25  ;;  %v2515_v36 = vor.u32 %v3044_v28, %v2512_v29 }
  0x57   : > { %v3028_v37 = vld [vmem:[%s3666_s29 + $0x4] sm:$0xf]  ;;  %v2448_v38 = vld [vmem:[%s3666_s29 + $0x8] sm:$0xf0]  ;;  %v2643_v39 = vor.u32 %v3076_v30, %v2640_v31  ;;  %v3686_v40 = vor.u32 %v3029_v34, %v2446_v33  ;;  %v2454_v42 = vld [vmem:[%s3666_s29 + $0x10] sm:$0xf] }
  0x58   : > { %904 = vmatpush.bf16.msra.mxu0 %v2543_v8  ;;  %v3688_v41 = vor.u32 %v3028_v37, %v2448_v38  ;;  %v3031_v43 = vld [vmem:[%s3666_s29 + $0x14] sm:$0xf0]  ;;  %v3030_v44 = vld [vmem:[%s3666_s29 + $0x14] sm:$0xf]  ;;  %v2456_v45 = vld [vmem:[%s3666_s29 + $0x18] sm:$0xf0] }
  0x59   : > { %953 = vmatpush.bf16.msra.mxu1 %v2671_v9  ;;  %1002 = vmatpush.bf16.msra.mxu2 %v2547_v10  ;;  %v3698_v46 = vor.u32 %v3031_v43, %v2454_v42  ;;  %v3700_v47 = vor.u32 %v3030_v44, %v2456_v45  ;;  %v2462_v48 = vld [vmem:[%s3666_s29 + $0x20] sm:$0xf]  ;;  %v3033_v49 = vld [vmem:[%s3666_s29 + $0x24] sm:$0xf0]  ;;  %v3032_v50 = vld [vmem:[%s3666_s29 + $0x24] sm:$0xf] }
  0x5a   : > { %1051 = vmatpush.bf16.msra.mxu3 %v2675_v14  ;;  %v2464_v51 = vld [vmem:[%s3666_s29 + $0x28] sm:$0xf0]  ;;  %v3710_v52 = vor.u32 %v3033_v49, %v2462_v48  ;;  %v2632_v55 = vld [vmem:[#allocation11 + $0xf8] sm:$0xf0]  ;;  %v2630_v59 = vld [vmem:[#allocation11 + $0xe8] sm:$0xf] }
  0x5b   : > { %v3712_v53 = vor.u32 %v3032_v50, %v2464_v51  ;;  %v3073_v54 = vld [vmem:[#allocation11 + $0xec] sm:$0xf]  ;;  %v2760_v58 = vld [vmem:[#allocation11 + $0x1f8] sm:$0xf0]  ;;  %v3075_v60 = vld [vmem:[#allocation11 + $0xf4] sm:$0xf0] }
  0x5c   : > { %905 = vmatpush.bf16.msra.mxu0 %v2527_v20  ;;  %v3105_v56 = vld [vmem:[#allocation11 + $0x1ec] sm:$0xf]  ;;  %v2635_v57 = vor.u32 %v3073_v54, %v2632_v55  ;;  %v2631_v62 = vor.u32 %v3075_v60, %v2630_v59  ;;  %v2758_v63 = vld [vmem:[#allocation11 + $0x1e8] sm:$0xf]  ;;  %v3107_v0 = vld [vmem:[#allocation11 + $0x1f4] sm:$0xf0] }
  0x5d   : > { %954 = vmatpush.bf16.msra.mxu1 %v2655_v22  ;;  %1003 = vmatpush.bf16.msra.mxu2 %v2531_v23  ;;  %v2763_v61 = vor.u32 %v3105_v56, %v2760_v58  ;;  %v2759_v1 = vor.u32 %v3107_v0, %v2758_v63  ;;  %v2470_v2 = vld [vmem:[%s3666_s29 + $0x30] sm:$0xf]  ;;  %v3035_v3 = vld [vmem:[%s3666_s29 + $0x34] sm:$0xf0]  ;;  %v3034_v4 = vld [vmem:[%s3666_s29 + $0x34] sm:$0xf] }
  0x5e   : > { %1052 = vmatpush.bf16.msra.mxu3 %v2659_v26  ;;  %v2472_v5 = vld [vmem:[%s3666_s29 + $0x38] sm:$0xf0]  ;;  %v3722_v6 = vor.u32 %v3035_v3, %v2470_v2  ;;  %v3069_v8 = vld [vmem:[#allocation11 + $0xcc] sm:$0xf]  ;;  %v2614_v13 = vld [vmem:[#allocation11 + $0xc8] sm:$0xf] }
  0x5f   : > { %v3724_v7 = vor.u32 %v3034_v4, %v2472_v5  ;;  %v2616_v9 = vld [vmem:[#allocation11 + $0xd8] sm:$0xf0]  ;;  %v3101_v10 = vld [vmem:[#allocation11 + $0x1cc] sm:$0xf]  ;;  %v3071_v14 = vld [vmem:[#allocation11 + $0xd4] sm:$0xf0] }
  0x60   : > { %906 = vmatpush.bf16.msra.mxu0 %v2511_v32  ;;  %v2619_v11 = vor.u32 %v3069_v8, %v2616_v9  ;;  %v2744_v12 = vld [vmem:[#allocation11 + $0x1d8] sm:$0xf0]  ;;  %v2615_v16 = vor.u32 %v3071_v14, %v2614_v13  ;;  %v2742_v17 = vld [vmem:[#allocation11 + $0x1c8] sm:$0xf]  ;;  %v3103_v18 = vld [vmem:[#allocation11 + $0x1d4] sm:$0xf0] }
  0x61   : > { %955 = vmatpush.bf16.msra.mxu1 %v2639_v35  ;;  %1004 = vmatpush.bf16.msra.mxu2 %v2515_v36  ;;  %v2747_v15 = vor.u32 %v3101_v10, %v2744_v12  ;;  %v2743_v19 = vor.u32 %v3103_v18, %v2742_v17  ;;  %v2478_v20 = vld [vmem:[%s3666_s29 + $0x40] sm:$0xf]  ;;  %v3037_v21 = vld [vmem:[%s3666_s29 + $0x44] sm:$0xf0]  ;;  %v3036_v22 = vld [vmem:[%s3666_s29 + $0x44] sm:$0xf] }
  0x62   : > { %1053 = vmatpush.bf16.msra.mxu3 %v2643_v39  ;;  %v2480_v23 = vld [vmem:[%s3666_s29 + $0x48] sm:$0xf0]  ;;  %v3734_v24 = vor.u32 %v3037_v21, %v2478_v20  ;;  %v2600_v27 = vld [vmem:[#allocation11 + $0xb8] sm:$0xf0]  ;;  %v2598_v31 = vld [vmem:[#allocation11 + $0xa8] sm:$0xf] }
  0x63   : > { %907 = vmatmul.bf16.vlgmr.msra.gmra.mxu0 %v3686_v40  ;;  %v3736_v25 = vor.u32 %v3036_v22, %v2480_v23  ;;  %v3065_v26 = vld [vmem:[#allocation11 + $0xac] sm:$0xf]  ;;  %v2728_v30 = vld [vmem:[#allocation11 + $0x1b8] sm:$0xf0]  ;;  %v3067_v32 = vld [vmem:[#allocation11 + $0xb4] sm:$0xf0] }
  0x64   : > { %956 = vmatmul.bf16.vlgmr.msra.gmra.mxu1 %v3688_v41  ;;  %1005 = vmatmul.bf16.vlgmr.msra.gmra.mxu2 %v3686_v40  ;;  %v3097_v28 = vld [vmem:[#allocation11 + $0x1ac] sm:$0xf]  ;;  %v2603_v29 = vor.u32 %v3065_v26, %v2600_v27  ;;  %v2599_v34 = vor.u32 %v3067_v32, %v2598_v31  ;;  %v2726_v35 = vld [vmem:[#allocation11 + $0x1a8] sm:$0xf]  ;;  %v3099_v36 = vld [vmem:[#allocation11 + $0x1b4] sm:$0xf0] }
  0x65   : > { %1054 = vmatmul.bf16.vlgmr.msra.gmra.mxu3 %v3688_v41  ;;  %1193 = vmatpush.bf16.msrb.mxu2 %v2635_v57  ;;  %v2731_v33 = vor.u32 %v3097_v28, %v2728_v30  ;;  %v2582_v37 = vld [vmem:[#allocation11 + $0x88] sm:$0xf]  ;;  %v2727_v38 = vor.u32 %v3099_v36, %v2726_v35  ;;  %v3063_v39 = vld [vmem:[#allocation11 + $0x94] sm:$0xf0]  ;;  %v3061_v45 = vld [vmem:[#allocation11 + $0x8c] sm:$0xf] }
  0x66   : > { %1242 = vmatpush.bf16.msrb.mxu3 %v2763_v61  ;;  %1095 = vmatpush.bf16.msrb.mxu0 %v2631_v62  ;;  %v2710_v42 = vld [vmem:[#allocation11 + $0x188] sm:$0xf]  ;;  %v3095_v43 = vld [vmem:[#allocation11 + $0x194] sm:$0xf0]  ;;  %v2583_v44 = vor.u32 %v3063_v39, %v2582_v37  ;;  %v2584_v48 = vld [vmem:[#allocation11 + $0x98] sm:$0xf0] }
  0x67   : > { %1144 = vmatpush.bf16.msrb.mxu1 %v2759_v1  ;;  %v3093_v49 = vld [vmem:[#allocation11 + $0x18c] sm:$0xf]  ;;  %v2711_v50 = vor.u32 %v3095_v43, %v2710_v42  ;;  %v2587_v51 = vor.u32 %v3061_v45, %v2584_v48  ;;  %v2712_v54 = vld [vmem:[#allocation11 + $0x198] sm:$0xf0]  ;;  %v2486_v56 = vld [vmem:[%s3666_s29 + $0x50] sm:$0xf] }
  0x68   : > { %v2715_v55 = vor.u32 %v3093_v49, %v2712_v54  ;;  %v3039_v57 = vld [vmem:[%s3666_s29 + $0x54] sm:$0xf0]  ;;  %v3038_v58 = vld [vmem:[%s3666_s29 + $0x54] sm:$0xf]  ;;  %v2488_v59 = vld [vmem:[%s3666_s29 + $0x58] sm:$0xf0] }
  0x69   : > { %1194 = vmatpush.bf16.msrb.mxu2 %v2619_v11  ;;  %v3746_v60 = vor.u32 %v3039_v57, %v2486_v56  ;;  %v3748_v61 = vor.u32 %v3038_v58, %v2488_v59  ;;  %v2566_v62 = vld [vmem:[#allocation11 + $0x68] sm:$0xf]  ;;  %v3059_v63 = vld [vmem:[#allocation11 + $0x74] sm:$0xf0]  ;;  %v3057_v3 = vld [vmem:[#allocation11 + $0x6c] sm:$0xf] }
  0x6a   : > { %1243 = vmatpush.bf16.msrb.mxu3 %v2747_v15  ;;  %1096 = vmatpush.bf16.msrb.mxu0 %v2615_v16  ;;  %v2694_v0 = vld [vmem:[#allocation11 + $0x168] sm:$0xf]  ;;  %v2567_v1 = vor.u32 %v3059_v63, %v2566_v62  ;;  %v3091_v2 = vld [vmem:[#allocation11 + $0x174] sm:$0xf0]  ;;  %v2568_v4 = vld [vmem:[#allocation11 + $0x78] sm:$0xf0] }
  0x6b   : > { %1145 = vmatpush.bf16.msrb.mxu1 %v2743_v19  ;;  %v2695_v5 = vor.u32 %v3091_v2, %v2694_v0  ;;  %v2571_v8 = vor.u32 %v3057_v3, %v2568_v4  ;;  %v3089_v9 = vld [vmem:[#allocation11 + $0x16c] sm:$0xf]  ;;  %v2696_v10 = vld [vmem:[#allocation11 + $0x178] sm:$0xf0]  ;;  %v2550_v11 = vld [vmem:[#allocation11 + $0x48] sm:$0xf] }
  0x6c   : > { %v2699_v12 = vor.u32 %v3089_v9, %v2696_v10  ;;  %v3055_v13 = vld [vmem:[#allocation11 + $0x54] sm:$0xf0]  ;;  %v2678_v14 = vld [vmem:[#allocation11 + $0x148] sm:$0xf]  ;;  %v3053_v18 = vld [vmem:[#allocation11 + $0x4c] sm:$0xf] }
  0x6d   : > { %1195 = vmatpush.bf16.msrb.mxu2 %v2603_v29  ;;  %v3087_v15 = vld [vmem:[#allocation11 + $0x154] sm:$0xf0]  ;;  %v2551_v16 = vor.u32 %v3055_v13, %v2550_v11  ;;  %v2552_v19 = vld [vmem:[#allocation11 + $0x58] sm:$0xf0]  ;;  %v3085_v20 = vld [vmem:[#allocation11 + $0x14c] sm:$0xf] }
  0x6e   : > { %1244 = vmatpush.bf16.msrb.mxu3 %v2731_v33  ;;  %1097 = vmatpush.bf16.msrb.mxu0 %v2599_v34  ;;  %v2679_v17 = vor.u32 %v3087_v15, %v2678_v14  ;;  %v2555_v21 = vor.u32 %v3053_v18, %v2552_v19  ;;  %v2680_v22 = vld [vmem:[#allocation11 + $0x158] sm:$0xf0]  ;;  %v2534_v23 = vld [vmem:[#allocation11 + $0x28] sm:$0xf]  ;;  %v3051_v26 = vld [vmem:[#allocation11 + $0x34] sm:$0xf0] }
  0x6f   : > { %1146 = vmatpush.bf16.msrb.mxu1 %v2727_v38  ;;  %v2683_v27 = vor.u32 %v3085_v20, %v2680_v22  ;;  %v2662_v28 = vld [vmem:[#allocation11 + $0x128] sm:$0xf]  ;;  %v3083_v29 = vld [vmem:[#allocation11 + $0x134] sm:$0xf0]  ;;  %v3049_v30 = vld [vmem:[#allocation11 + $0x2c] sm:$0xf]  ;;  %v2535_v31 = vor.u32 %v3051_v26, %v2534_v23 }
  0x70   : > { %v2536_v32 = vld [vmem:[#allocation11 + $0x38] sm:$0xf0]  ;;  %v3081_v33 = vld [vmem:[#allocation11 + $0x12c] sm:$0xf]  ;;  %v2663_v35 = vor.u32 %v3083_v29, %v2662_v28  ;;  %v2494_v37 = vld [vmem:[%s3666_s29 + $0x60] sm:$0xf] }
  0x71   : > { %1196 = vmatpush.bf16.msrb.mxu2 %v2587_v51  ;;  %v2664_v34 = vld [vmem:[#allocation11 + $0x138] sm:$0xf0]  ;;  %v2539_v36 = vor.u32 %v3049_v30, %v2536_v32  ;;  %v3041_v38 = vld [vmem:[%s3666_s29 + $0x64] sm:$0xf0]  ;;  %v3040_v42 = vld [vmem:[%s3666_s29 + $0x64] sm:$0xf] }
  0x72   : > { %1098 = vmatpush.bf16.msrb.mxu0 %v2583_v44  ;;  %1245 = vmatpush.bf16.msrb.mxu3 %v2715_v55  ;;  %v2667_v39 = vor.u32 %v3081_v33, %v2664_v34  ;;  %v2496_v43 = vld [vmem:[%s3666_s29 + $0x68] sm:$0xf0]  ;;  %v3758_v44 = vor.u32 %v3041_v38, %v2494_v37  ;;  %v2518_v45 = vld [vmem:[#allocation11 + $0x8] sm:$0xf]  ;;  %v3047_v48 = vld [vmem:[#allocation11 + $0x14] sm:$0xf0] }
  0x73   : > { %912 = vmatmul.bf16.gmra.mxu0 %v3698_v46  ;;  %1147 = vmatpush.bf16.msrb.mxu1 %v2711_v50  ;;  %v2646_v49 = vld [vmem:[#allocation11 + $0x108] sm:$0xf]  ;;  %v3760_v50 = vor.u32 %v3040_v42, %v2496_v43  ;;  %v2519_v51 = vor.u32 %v3047_v48, %v2518_v45  ;;  %v3079_v54 = vld [vmem:[#allocation11 + $0x114] sm:$0xf0]  ;;  %v3045_v55 = vld [vmem:[#allocation11 + $0xc] sm:$0xf] }
  0x74   : > { %961 = vmatmul.bf16.gmra.mxu1 %v3700_v47  ;;  %1010 = vmatmul.bf16.gmra.mxu2 %v3698_v46  ;;  %v2520_v56 = vld [vmem:[#allocation11 + $0x18] sm:$0xf0]  ;;  %v2647_v57 = vor.u32 %v3079_v54, %v2646_v49  ;;  %v3077_v59 = vld [vmem:[#allocation11 + $0x10c] sm:$0xf]  ;;  %v2502_v0 = vld [vmem:[%s3666_s29 + $0x70] sm:$0xf] }
  0x75   : > { %1059 = vmatmul.bf16.gmra.mxu3 %v3700_v47  ;;  %1197 = vmatpush.bf16.msrb.mxu2 %v2571_v8  ;;  %v2523_v58 = vor.u32 %v3045_v55, %v2520_v56  ;;  %v2648_v62 = vld [vmem:[#allocation11 + $0x118] sm:$0xf0]  ;;  %v3042_v2 = vld [vmem:[%s3666_s29 + $0x74] sm:$0xf]  ;;  %s1892_s25 = sld [smem:[#allocation6]]  ;;  %s2892_s28 = sshll.u32 %s3591_s0, 7 }
  0x76   : > { %1099 = vmatpush.bf16.msrb.mxu0 %v2567_v1  ;;  %1246 = vmatpush.bf16.msrb.mxu3 %v2699_v12  ;;  %v2651_v63 = vor.u32 %v3077_v59, %v2648_v62  ;;  %v3043_v1 = vld [vmem:[%s3666_s29 + $0x74] sm:$0xf0]  ;;  %v2504_v3 = vld [vmem:[%s3666_s29 + $0x78] sm:$0xf0]  ;;  %vm1897_vm3 = vcmask 1040384   ;;  %vm1920_vm4 = vcmask 0  }
  0x77   : > { %1148 = vmatpush.bf16.msrb.mxu1 %v2695_v5  ;;  %v3770_v4 = vor.u32 %v3043_v1, %v2502_v0  ;;  %v3772_v5 = vor.u32 %v3042_v2, %v2504_v3  ;;  %v3781_v8 = vld [vmem:[%s4136_s3] sm:$0xf]  ;;  %vm1991_vm5 = vcmask 1042434   ;;  %vm1993_vm6 = vcmask 1041408   ;;  %p2893_p1 = scmp.ne.s32.totalorder %s3591_s0, 2 }
  0x78   : > { %v3784_v9 = vperm.slane %v3781_v8, 0  ;;  %v3791_v14 = vperm.slane %v3781_v8, 1 }
  0x79   : > { %1198 = vmatpush.bf16.msrb.mxu2 %v2555_v21 }
  0x7a   : > { %1100 = vmatpush.bf16.msrb.mxu0 %v2551_v16  ;;  %1247 = vmatpush.bf16.msrb.mxu3 %v2683_v27 }
  0x7b   : > { %1149 = vmatpush.bf16.msrb.mxu1 %v2679_v17 }
  0x7d   : > { %1199 = vmatpush.bf16.msrb.mxu2 %v2539_v36 }
  0x7e   : > { %1101 = vmatpush.bf16.msrb.mxu0 %v2535_v31  ;;  %1248 = vmatpush.bf16.msrb.mxu3 %v2667_v39 }
  0x7f   : > { %1150 = vmatpush.bf16.msrb.mxu1 %v2663_v35 }
  0x81   : > { %1200 = vmatpush.bf16.msrb.mxu2 %v2523_v58 }
  0x82   : > { %1102 = vmatpush.bf16.msrb.mxu0 %v2519_v51  ;;  %1249 = vmatpush.bf16.msrb.mxu3 %v2651_v63 }
  0x83   : > { %917 = vmatmul.bf16.gmra.mxu0 %v3710_v52  ;;  %1151 = vmatpush.bf16.msrb.mxu1 %v2647_v57 }
  0x84   : > { %966 = vmatmul.bf16.gmra.mxu1 %v3712_v53  ;;  %1015 = vmatmul.bf16.gmra.mxu2 %v3710_v52 }
  0x85   : > { %1064 = vmatmul.bf16.gmra.mxu3 %v3712_v53 }
  0x93   : > { %922 = vmatmul.bf16.gmra.mxu0 %v3722_v6 }
  0x94   : > { %971 = vmatmul.bf16.gmra.mxu1 %v3724_v7  ;;  %1020 = vmatmul.bf16.gmra.mxu2 %v3722_v6 }
  0x95   : > { %1069 = vmatmul.bf16.gmra.mxu3 %v3724_v7 }
  0xa3   : > { %927 = vmatmul.bf16.gmra.mxu0 %v3734_v24 }
  0xa4   : > { %976 = vmatmul.bf16.gmra.mxu1 %v3736_v25  ;;  %1025 = vmatmul.bf16.gmra.mxu2 %v3734_v24 }
  0xa5   : > { %1074 = vmatmul.bf16.gmra.mxu3 %v3736_v25 }
  0xb3   : > { %932 = vmatmul.bf16.gmra.mxu0 %v3746_v60 }
  0xb4   : > { %981 = vmatmul.bf16.gmra.mxu1 %v3748_v61  ;;  %1030 = vmatmul.bf16.gmra.mxu2 %v3746_v60 }
  0xb5   : > { %1079 = vmatmul.bf16.gmra.mxu3 %v3748_v61 }
  0xc3   : > { %937 = vmatmul.bf16.gmra.mxu0 %v3758_v44 }
  0xc4   : > { %986 = vmatmul.bf16.gmra.mxu1 %v3760_v50  ;;  %1035 = vmatmul.bf16.gmra.mxu2 %v3758_v44 }
  0xc5   : > { %1084 = vmatmul.bf16.gmra.mxu3 %v3760_v50 }
  0xd3   : > { %942 = vmatmul.bf16.gmra.mxu0 %v3770_v4 }
  0xd4   : > { %991 = vmatmul.bf16.gmra.mxu1 %v3772_v5  ;;  %1040 = vmatmul.bf16.gmra.mxu2 %v3770_v4 }
  0xd5   : > { %1089 = vmatmul.bf16.gmra.mxu3 %v3772_v5 }
  0xe0   : > { %v908_v10 = vpop.f32.mrf.mxu0 }
  0xe1   : > { %v909_v11 = vadd.f32 %v908_v10, %v3784_v9  ;;  %v957_v12 = vpop.f32.mrf.mxu1 }
  0xe3   : > { %v958_v13 = vadd.f32 %v957_v12, %v909_v11  ;;  %1103 = vmatmul.bf16.vlgmr.msrb.gmra.mxu0 %v3686_v40 }
  0xe4   : > { %1152 = vmatmul.bf16.vlgmr.msrb.gmra.mxu1 %v3688_v41  ;;  %1201 = vmatmul.bf16.vlgmr.msrb.gmra.mxu2 %v3686_v40 }
  0xe5   : > { %1250 = vmatmul.bf16.vlgmr.msrb.gmra.mxu3 %v3688_v41  ;;  %v1291_v23 = vmax.f32 %v958_v13, 0.0 }
  0xe7   : > { %v1006_v15 = vpop.f32.mrf.mxu2 }
  0xe8   : > { %v1007_v16 = vadd.f32 %v1006_v15, %v3791_v14  ;;  %v1055_v17 = vpop.f32.mrf.mxu3  ;;  %v910_v18 = vpop.f32.mrf.mxu0 }
  0xe9   : > { %v911_v19 = vadd.f32 %v910_v18, %v3784_v9  ;;  %v959_v20 = vpop.f32.mrf.mxu1 }
  0xea   : > { %v1056_v21 = vadd.f32 %v1055_v17, %v1007_v16 }
  0xeb   : > { %v960_v22 = vadd.f32 %v959_v20, %v911_v19 }
  0xec   : > { %v1292_v34 = vmax.f32 %v1056_v21, 0.0 }
  0xed   : > { %v1295_v26 = vmax.f32 %v960_v22, 0.0 }
  0xef   : > { %v3796_v27 = vpack.c.bf16 %v1295_v26, %v1291_v23  ;;  %v1008_v40 = vpop.f32.mrf.mxu2 }
  0xf0   : > { %v1009_v28 = vadd.f32 %v1008_v40, %v3791_v14  ;;  %v1057_v29 = vpop.f32.mrf.mxu3  ;;  %v913_v30 = vpop.f32.mrf.mxu0 }
  0xf1   : > { %v914_v41 = vadd.f32 %v913_v30, %v3784_v9  ;;  %v962_v31 = vpop.f32.mrf.mxu1 }
  0xf2   : > { %v1058_v32 = vadd.f32 %v1057_v29, %v1009_v28 }
  0xf3   : > { %v963_v33 = vadd.f32 %v962_v31, %v914_v41  ;;  %1108 = vmatmul.bf16.gmra.mxu0 %v3698_v46 }
  0xf4   : > { %v1296_v35 = vmax.f32 %v1058_v32, 0.0  ;;  %1157 = vmatmul.bf16.gmra.mxu1 %v3700_v47  ;;  %1206 = vmatmul.bf16.gmra.mxu2 %v3698_v46 }
  0xf5   : > { %1255 = vmatmul.bf16.gmra.mxu3 %v3700_v47  ;;  %v1299_v51 = vmax.f32 %v963_v33, 0.0 }
  0xf6   : > { %v3804_v36 = vpack.c.bf16 %v1296_v35, %v1292_v34 }
  0xf7   : > { %v1011_v37 = vpop.f32.mrf.mxu2 }
  0xf8   : > { %v1012_v38 = vadd.f32 %v1011_v37, %v3791_v14  ;;  %v1060_v39 = vpop.f32.mrf.mxu3  ;;  %v915_v42 = vpop.f32.mrf.mxu0 }
  0xf9   : > { %v916_v43 = vadd.f32 %v915_v42, %v3784_v9  ;;  %v964_v45 = vpop.f32.mrf.mxu1  ;;  %v3131_v42 = vld [vmem:[#allocation13 + $0xb8] sm:$0xff] }
  0xfa   : > { %v1061_v48 = vadd.f32 %v1060_v39, %v1012_v38  ;;  %1745 = vmatpush.bf16.msra.mxu2 %v3131_v42  ;;  %v3137_v42 = vld [vmem:[#allocation13 + $0xe8] sm:$0xff] }
  0xfb   : > { %v965_v49 = vadd.f32 %v964_v45, %v916_v43 }
  0xfc   : > { %v1300_v0 = vmax.f32 %v1061_v48, 0.0  ;;  %v3115_v48 = vld [vmem:[#allocation13 + $0x38] sm:$0xff] }
  0xfd   : > { %v1303_v54 = vmax.f32 %v965_v49, 0.0  ;;  %v3139_v49 = vld [vmem:[#allocation13 + $0xf8] sm:$0xff]  ;;  %1647 = vmatpush.bf16.msra.mxu0 %v3115_v48  ;;  %v3108_v48 = vld [vmem:[#allocation13] sm:$0xff] }
  0xfe   : > { %1794 = vmatpush.bf16.msra.mxu3 %v3139_v49  ;;  %v3116_v49 = vld [vmem:[#allocation13 + $0x40] sm:$0xff] }
  0xff   : > { %v1013_v55 = vpop.f32.mrf.mxu2  ;;  %v3808_v56 = vpack.c.bf16 %v1303_v54, %v1299_v51 }
 0x100   : > { %v1014_v46 = vadd.f32 %v1013_v55, %v3791_v14  ;;  %v1062_v47 = vpop.f32.mrf.mxu3  ;;  %v918_v57 = vpop.f32.mrf.mxu0 }
 0x101   : > { %v919_v58 = vadd.f32 %v918_v57, %v3784_v9  ;;  %v967_v59 = vpop.f32.mrf.mxu1 }
 0x102   : > { %v1063_v62 = vadd.f32 %v1062_v47, %v1014_v46 }
 0x103   : > { %v968_v63 = vadd.f32 %v967_v59, %v919_v58  ;;  %1113 = vmatmul.bf16.gmra.mxu0 %v3710_v52 }
 0x104   : > { %v1304_v1 = vmax.f32 %v1063_v62, 0.0  ;;  %1162 = vmatmul.bf16.gmra.mxu1 %v3712_v53  ;;  %1211 = vmatmul.bf16.gmra.mxu2 %v3710_v52 }
 0x105   : > { %1260 = vmatmul.bf16.gmra.mxu3 %v3712_v53  ;;  %v1307_v18 = vmax.f32 %v968_v63, 0.0 }
 0x106   : > { %v3816_v2 = vpack.c.bf16 %v1304_v1, %v1300_v0 }
 0x107   : > { %v1016_v3 = vpop.f32.mrf.mxu2 }
 0x108   : > { %v1017_v10 = vadd.f32 %v1016_v3, %v3791_v14  ;;  %v1065_v11 = vpop.f32.mrf.mxu3  ;;  %v920_v12 = vpop.f32.mrf.mxu0 }
 0x109   : > { %v921_v13 = vadd.f32 %v920_v12, %v3784_v9  ;;  %v969_v15 = vpop.f32.mrf.mxu1  ;;  %v3114_v12 = vld [vmem:[#allocation13 + $0x30] sm:$0xff] }
 0x10a   : > { %v1066_v16 = vadd.f32 %v1065_v11, %v1017_v10  ;;  %1648 = vmatpush.bf16.msra.mxu0 %v3114_v12  ;;  %v3133_v12 = vld [vmem:[#allocation13 + $0xc8] sm:$0xff] }
 0x10b   : > { %v970_v17 = vadd.f32 %v969_v15, %v921_v13  ;;  %v3122_v13 = vld [vmem:[#allocation13 + $0x70] sm:$0xff] }
 0x10c   : > { %v1308_v29 = vmax.f32 %v1066_v16, 0.0 }
 0x10d   : > { %v1311_v19 = vmax.f32 %v970_v17, 0.0  ;;  %v3130_v17 = vld [vmem:[#allocation13 + $0xb0] sm:$0xff] }
 0x10e   : > { %1746 = vmatpush.bf16.msra.mxu2 %v3130_v17 }
 0x10f   : > { %v1018_v20 = vpop.f32.mrf.mxu2  ;;  %v3820_v21 = vpack.c.bf16 %v1311_v19, %v1307_v18  ;;  %v3121_v18 = vld [vmem:[#allocation13 + $0x68] sm:$0xff] }
 0x110   : > { %v1019_v52 = vadd.f32 %v1018_v20, %v3791_v14  ;;  %v1067_v53 = vpop.f32.mrf.mxu3  ;;  %v923_v22 = vpop.f32.mrf.mxu0 }
 0x111   : > { %v924_v23 = vadd.f32 %v923_v22, %v3784_v9  ;;  %v972_v26 = vpop.f32.mrf.mxu1  ;;  %v3120_v22 = vld [vmem:[#allocation13 + $0x60] sm:$0xff] }
 0x112   : > { %v1068_v40 = vadd.f32 %v1067_v53, %v1019_v52  ;;  %v3112_v53 = vld [vmem:[#allocation13 + $0x20] sm:$0xff] }
 0x113   : > { %v973_v28 = vadd.f32 %v972_v26, %v924_v23  ;;  %1118 = vmatmul.bf16.gmra.mxu0 %v3722_v6  ;;  %v3129_v26 = vld [vmem:[#allocation13 + $0xa8] sm:$0xff] }
 0x114   : > { %v1312_v30 = vmax.f32 %v1068_v40, 0.0  ;;  %1167 = vmatmul.bf16.gmra.mxu1 %v3724_v7  ;;  %1216 = vmatmul.bf16.gmra.mxu2 %v3722_v6  ;;  %v3123_v6 = vld [vmem:[#allocation13 + $0x78] sm:$0xff] }
 0x115   : > { %1265 = vmatmul.bf16.gmra.mxu3 %v3724_v7  ;;  %v1315_v43 = vmax.f32 %v973_v28, 0.0  ;;  %1696 = vmatpush.bf16.msra.mxu1 %v3123_v6  ;;  %v3111_v40 = vld [vmem:[#allocation13 + $0x18] sm:$0xff] }
 0x116   : > { %v3828_v41 = vpack.c.bf16 %v1312_v30, %v1308_v29  ;;  %v3119_v28 = vld [vmem:[#allocation13 + $0x58] sm:$0xff]  ;;  %1747 = vmatpush.bf16.msra.mxu2 %v3129_v26  ;;  %v3128_v29 = vld [vmem:[#allocation13 + $0xa0] sm:$0xff] }
 0x117   : > { %v1021_v31 = vpop.f32.mrf.mxu2 }
 0x118   : > { %v1022_v32 = vadd.f32 %v1021_v31, %v3791_v14  ;;  %v1070_v33 = vpop.f32.mrf.mxu3  ;;  %v925_v34 = vpop.f32.mrf.mxu0 }
 0x119   : > { %v926_v35 = vadd.f32 %v925_v34, %v3784_v9  ;;  %v974_v37 = vpop.f32.mrf.mxu1  ;;  %1697 = vmatpush.bf16.msra.mxu1 %v3122_v13  ;;  %v3118_v34 = vld [vmem:[#allocation13 + $0x50] sm:$0xff] }
 0x11a   : > { %v1071_v38 = vadd.f32 %v1070_v33, %v1022_v32  ;;  %v3110_v33 = vld [vmem:[#allocation13 + $0x10] sm:$0xff]  ;;  %1748 = vmatpush.bf16.msra.mxu2 %v3128_v29 }
 0x11b   : > { %v975_v39 = vadd.f32 %v974_v37, %v926_v35  ;;  %v3109_v37 = vld [vmem:[#allocation13 + $0x8] sm:$0xff] }
 0x11c   : > { %v1316_v62 = vmax.f32 %v1071_v38, 0.0  ;;  %v3126_v38 = vld [vmem:[#allocation13 + $0x90] sm:$0xff] }
 0x11d   : > { %v1319_v45 = vmax.f32 %v975_v39, 0.0  ;;  %1698 = vmatpush.bf16.msra.mxu1 %v3121_v18 }
 0x11f   : > { %v1023_v7 = vpop.f32.mrf.mxu2  ;;  %v3832_v51 = vpack.c.bf16 %v1319_v45, %v1315_v43 }
 0x120   : > { %v1024_v54 = vadd.f32 %v1023_v7, %v3791_v14  ;;  %v1072_v55 = vpop.f32.mrf.mxu3  ;;  %v928_v46 = vpop.f32.mrf.mxu0  ;;  %v3125_v7 = vld [vmem:[#allocation13 + $0x88] sm:$0xff] }
 0x121   : > { %v929_v47 = vadd.f32 %v928_v46, %v3784_v9  ;;  %v977_v57 = vpop.f32.mrf.mxu1  ;;  %1699 = vmatpush.bf16.msra.mxu1 %v3120_v22 }
 0x122   : > { %v1073_v58 = vadd.f32 %v1072_v55, %v1024_v54  ;;  %v3136_v54 = vld [vmem:[#allocation13 + $0xe0] sm:$0xff] }
 0x123   : > { %v3836_v59 = vadd.f32 %v977_v57, %v929_v47  ;;  %1123 = vmatmul.bf16.gmra.mxu0 %v3734_v24  ;;  %v3124_v55 = vld [vmem:[#allocation13 + $0x80] sm:$0xff] }
 0x124   : > { %v1320_v63 = vmax.f32 %v1073_v58, 0.0  ;;  %1172 = vmatmul.bf16.gmra.mxu1 %v3736_v25  ;;  %1221 = vmatmul.bf16.gmra.mxu2 %v3734_v24  ;;  %v3113_v24 = vld [vmem:[#allocation13 + $0x28] sm:$0xff]  ;;  %v3135_v58 = vld [vmem:[#allocation13 + $0xd8] sm:$0xff] }
 0x125   : > { %1270 = vmatmul.bf16.gmra.mxu3 %v3736_v25  ;;  %v3138_v25 = vld [vmem:[#allocation13 + $0xf0] sm:$0xff]  ;;  %1649 = vmatpush.bf16.msra.mxu0 %v3113_v24 }
 0x126   : > { %v3842_v0 = vpack.c.bf16 %v1320_v63, %v1316_v62  ;;  %1795 = vmatpush.bf16.msra.mxu3 %v3138_v25  ;;  %1700 = vmatpush.bf16.msra.mxu1 %v3119_v28  ;;  %v3134_v63 = vld [vmem:[#allocation13 + $0xd0] sm:$0xff] }
 0x127   : > { %v1026_v1 = vpop.f32.mrf.mxu2 }
 0x128   : > { %v1027_v3 = vadd.f32 %v1026_v1, %v3791_v14  ;;  %v1075_v10 = vpop.f32.mrf.mxu3  ;;  %v3845_v11 = vpop.f32.mrf.mxu0 }
 0x129   : > { %v3847_v15 = vpop.f32.mrf.mxu1  ;;  %1650 = vmatpush.bf16.msra.mxu0 %v3112_v53 }
 0x12a   : > { %v3849_v16 = vadd.f32 %v1075_v10, %v1027_v3  ;;  %1701 = vmatpush.bf16.msra.mxu1 %v3118_v34  ;;  %1796 = vmatpush.bf16.msra.mxu3 %v3137_v42 }
 0x12d   : > { %1651 = vmatpush.bf16.msra.mxu0 %v3111_v40 }
 0x12e   : > { %1797 = vmatpush.bf16.msra.mxu3 %v3136_v54 }
 0x12f   : > { %v3851_v19 = vpop.f32.mrf.mxu2 }
 0x130   : > { %v3853_v20 = vpop.f32.mrf.mxu3  ;;  %v3855_v52 = vpop.f32.mrf.mxu0 }
 0x131   : > { %v3857_v23 = vpop.f32.mrf.mxu1  ;;  %1652 = vmatpush.bf16.msra.mxu0 %v3110_v33 }
 0x132   : > { %1798 = vmatpush.bf16.msra.mxu3 %v3135_v58  ;;  %v3902_v58 = vperm.slane %v3781_v8, 2 }
 0x133   : > { %1128 = vmatmul.bf16.gmra.mxu0 %v3746_v60 }
 0x134   : > { %1177 = vmatmul.bf16.gmra.mxu1 %v3748_v61  ;;  %1226 = vmatmul.bf16.gmra.mxu2 %v3746_v60  ;;  %v3127_v60 = vld [vmem:[#allocation13 + $0x98] sm:$0xff] }
 0x135   : > { %1275 = vmatmul.bf16.gmra.mxu3 %v3748_v61  ;;  %v3117_v61 = vld [vmem:[#allocation13 + $0x48] sm:$0xff]  ;;  %1749 = vmatpush.bf16.msra.mxu2 %v3127_v60 }
 0x136   : > { %1653 = vmatpush.bf16.msra.mxu0 %v3109_v37  ;;  %1702 = vmatpush.bf16.msra.mxu1 %v3117_v61 }
 0x137   : > { %v3863_v30 = vpop.f32.mrf.mxu2  ;;  %1799 = vmatpush.bf16.msra.mxu3 %v3134_v63 }
 0x138   : > { %v3865_v31 = vpop.f32.mrf.mxu3  ;;  %v3867_v32 = vpop.f32.mrf.mxu0 }
 0x139   : > { %v3869_v35 = vpop.f32.mrf.mxu1  ;;  %1750 = vmatpush.bf16.msra.mxu2 %v3126_v38  ;;  %v931_v38 = vadd.f32 %v3845_v11, %v3784_v9 }
 0x13a   : > { %1654 = vmatpush.bf16.msra.mxu0 %v3108_v48  ;;  %1703 = vmatpush.bf16.msra.mxu1 %v3116_v49 }
 0x13b   : > { %1800 = vmatpush.bf16.msra.mxu3 %v3133_v12 }
 0x13d   : > { %1751 = vmatpush.bf16.msra.mxu2 %v3125_v7 }
 0x13f   : > { %v3871_v39 = vpop.f32.mrf.mxu2 }
 0x140   : > { %v3873_v43 = vpop.f32.mrf.mxu3  ;;  %v938_v45 = vpop.f32.mrf.mxu0  ;;  %v1034_v11 = vadd.f32 %v3871_v39, %v3791_v14 }
 0x141   : > { %v987_v6 = vpop.f32.mrf.mxu1  ;;  %1752 = vmatpush.bf16.msra.mxu2 %v3124_v55  ;;  %v939_v53 = vadd.f32 %v938_v45, %v3784_v9 }
 0x143   : > { %1133 = vmatmul.bf16.gmra.mxu0 %v3758_v44  ;;  %v988_v34 = vadd.f32 %v987_v6, %v939_v53  ;;  %v3925_v53 = vperm.slane %v3781_v8, 3 }
 0x144   : > { %1182 = vmatmul.bf16.gmra.mxu1 %v3760_v50  ;;  %1231 = vmatmul.bf16.gmra.mxu2 %v3758_v44 }
 0x145   : > { %1280 = vmatmul.bf16.gmra.mxu3 %v3760_v50  ;;  %v3132_v50 = vld [vmem:[#allocation13 + $0xc0] sm:$0xff] }
 0x146   : > { %1801 = vmatpush.bf16.msra.mxu3 %v3132_v50 }
 0x147   : > { %v1036_v46 = vpop.f32.mrf.mxu2 }
 0x148   : > { %v1085_v47 = vpop.f32.mrf.mxu3  ;;  %v940_v57 = vpop.f32.mrf.mxu0  ;;  %v1037_v49 = vadd.f32 %v1036_v46, %v3791_v14  ;;  %v980_v46 = vadd.f32 %v3847_v15, %v931_v38  ;;  %v1029_v15 = vadd.f32 %v3851_v19, %v3791_v14  ;;  %v1324_v38 = vmax.f32 %v3849_v16, 0.0 }
 0x149   : > { %v989_v62 = vpop.f32.mrf.mxu1  ;;  %v941_v17 = vadd.f32 %v940_v57, %v3784_v9  ;;  %v1339_v57 = vmax.f32 %v988_v34, 0.0 }
 0x14b   : > { %v990_v28 = vadd.f32 %v989_v62, %v941_v17 }
 0x14d   : > { %v1343_v45 = vmax.f32 %v990_v28, 0.0 }
 0x14f   : > { %v1038_v1 = vpop.f32.mrf.mxu2 }
 0x150   : > { %v1087_v3 = vpop.f32.mrf.mxu3  ;;  %v943_v10 = vpop.f32.mrf.mxu0  ;;  %v1039_v61 = vadd.f32 %v1038_v1, %v3791_v14  ;;  %v3909_v1 = vpack.c.bf16 %v1343_v45, %v1339_v57 }
 0x151   : > { %v992_v44 = vpop.f32.mrf.mxu1  ;;  %v944_v13 = vadd.f32 %v943_v10, %v3784_v9  ;;  %v1086_v10 = vadd.f32 %v1085_v47, %v1037_v49 }
 0x153   : > { %1138 = vmatmul.bf16.gmra.mxu0 %v3770_v4  ;;  %v993_v22 = vadd.f32 %v992_v44, %v944_v13 }
 0x154   : > { %1187 = vmatmul.bf16.gmra.mxu1 %v3772_v5  ;;  %1236 = vmatmul.bf16.gmra.mxu2 %v3770_v4  ;;  %v936_v4 = vadd.f32 %v3867_v32, %v3784_v9 }
 0x155   : > { %1285 = vmatmul.bf16.gmra.mxu3 %v3772_v5  ;;  %v934_v5 = vadd.f32 %v3855_v52, %v3784_v9  ;;  %v1347_v60 = vmax.f32 %v993_v22, 0.0 }
 0x156   : > { %v985_v42 = vadd.f32 %v3869_v35, %v936_v4  ;;  %v1088_v35 = vadd.f32 %v1087_v3, %v1039_v61  ;;  %v1083_v3 = vadd.f32 %v3873_v43, %v1034_v11  ;;  %v1078_v4 = vadd.f32 %v3853_v20, %v1029_v15 }
 0x157   : > { %v1041_v24 = vpop.f32.mrf.mxu2  ;;  %v983_v55 = vadd.f32 %v3857_v23, %v934_v5  ;;  %v1032_v23 = vadd.f32 %v3863_v30, %v3791_v14 }
 0x158   : > { %v1090_v18 = vpop.f32.mrf.mxu3  ;;  %v945_v25 = vpop.f32.mrf.mxu0  ;;  %v1042_v33 = vadd.f32 %v1041_v24, %v3791_v14  ;;  %v1335_v63 = vmax.f32 %v985_v42, 0.0  ;;  %v1344_v13 = vmax.f32 %v1088_v35, 0.0  ;;  %v1327_v24 = vmax.f32 %v980_v46, 0.0 }
 0x159   : > { %v946_v26 = vadd.f32 %v945_v25, %v3784_v9  ;;  %v994_v40 = vpop.f32.mrf.mxu1  ;;  %v1331_v50 = vmax.f32 %v983_v55, 0.0  ;;  %v1340_v25 = vmax.f32 %v1086_v10, 0.0  ;;  %v1336_v28 = vmax.f32 %v1083_v3, 0.0 }
 0x15a   : > { %v1091_v7 = vadd.f32 %v1090_v18, %v1042_v33  ;;  %v1081_v18 = vadd.f32 %v3865_v31, %v1032_v23 }
 0x15b   : > { %v995_v29 = vadd.f32 %v994_v40, %v946_v26  ;;  %v3921_v47 = vpack.c.bf16 %v1335_v63, %v1331_v50  ;;  %v3932_v31 = vpack.c.bf16 %v1344_v13, %v1340_v25 }
 0x15c   : > { %v1348_v12 = vmax.f32 %v1091_v7, 0.0  ;;  %v1332_v33 = vmax.f32 %v1081_v18, 0.0 }
 0x15d   : > { %v1351_v37 = vmax.f32 %v995_v29, 0.0 }
 0x15f   : > { %v3896_v48 = vpack.c.bf16 %v1351_v37, %v1347_v60  ;;  %v1043_v32 = vpop.f32.mrf.mxu2  ;;  %v1328_v60 = vmax.f32 %v1078_v4, 0.0  ;;  %v3939_v37 = vpack.c.bf16 %v1336_v28, %v1332_v33 }
 0x160   : > { %v1044_v54 = vadd.f32 %v1043_v32, %v3791_v14  ;;  %v1092_v52 = vpop.f32.mrf.mxu3  ;;  %v1104_v6 = vpop.f32.mrf.mxu0  ;;  %v1323_v14 = vmax.f32 %v3836_v59, 0.0 }
 0x161   : > { %v1153_v9 = vpop.f32.mrf.mxu1  ;;  %1931 = vmatpush.bf16.msrb.mxu1 %v3896_v48  ;;  %v1105_v39 = vadd.f32 %v1104_v6, %v3902_v58 }
 0x162   : > { %v1093_v62 = vadd.f32 %v1092_v52, %v1044_v54  ;;  %v3934_v8 = vpack.c.bf16 %v1327_v24, %v1323_v14  ;;  %v3948_v52 = vpack.c.bf16 %v1328_v60, %v1324_v38 }
 0x163   : > { %1655 = vmatmul.bf16.vlgmr.msra.gmra.mxu0 %v3796_v27  ;;  %v1154_v19 = vadd.f32 %v1153_v9, %v1105_v39 }
 0x164   : > { %v1352_v44 = vmax.f32 %v1093_v62, 0.0  ;;  %1704 = vmatmul.bf16.vlgmr.msra.gmra.mxu1 %v3804_v36 }
 0x165   : > { %1932 = vmatpush.bf16.msrb.mxu1 %v3909_v1  ;;  %v1293_v59 = vmax.f32 %v1154_v19, 0.0 }
 0x166   : > { %v3919_v17 = vpack.c.bf16 %v1352_v44, %v1348_v12 }
 0x167   : > { %v1202_v30 = vpop.f32.mrf.mxu2 }
 0x168   : > { %v1251_v22 = vpop.f32.mrf.mxu3  ;;  %1944 = vmatpush.bf16.msrb.mxu2 %v3919_v17  ;;  %v1106_v26 = vpop.f32.mrf.mxu0  ;;  %v1203_v5 = vadd.f32 %v1202_v30, %v3925_v53 }
 0x169   : > { %v1107_v43 = vadd.f32 %v1106_v26, %v3902_v58  ;;  %v1155_v40 = vpop.f32.mrf.mxu1  ;;  %1933 = vmatpush.bf16.msrb.mxu1 %v3921_v47 }
 0x16a   : > { %v1252_v42 = vadd.f32 %v1251_v22, %v1203_v5 }
 0x16b   : > { %v1156_v29 = vadd.f32 %v1155_v40, %v1107_v43 }
 0x16c   : > { %1945 = vmatpush.bf16.msrb.mxu2 %v3932_v31  ;;  %v1294_v6 = vmax.f32 %v1252_v42, 0.0 }
 0x16d   : > { %v1297_v34 = vmax.f32 %v1156_v29, 0.0  ;;  %1934 = vmatpush.bf16.msrb.mxu1 %v3934_v8 }
 0x16f   : > { %v3941_v61 = vpack.c.bf16 %v1297_v34, %v1293_v59  ;;  %v1204_v20 = vpop.f32.mrf.mxu2 }
 0x170   : > { %v1205_v45 = vadd.f32 %v1204_v20, %v3925_v53  ;;  %v1253_v32 = vpop.f32.mrf.mxu3  ;;  %1946 = vmatpush.bf16.msrb.mxu2 %v3939_v37  ;;  %v1109_v49 = vpop.f32.mrf.mxu0 }
 0x171   : > { %v1158_v7 = vpop.f32.mrf.mxu1  ;;  %1753 = vmatmul.bf16.vlgmr.msra.gmra.mxu2 %v3941_v61  ;;  %1935 = vmatpush.bf16.msrb.mxu1 %v3832_v51  ;;  %v1110_v16 = vadd.f32 %v1109_v49, %v3902_v58 }
 0x172   : > { %v1254_v54 = vadd.f32 %v1253_v32, %v1205_v45 }
 0x173   : > { %1660 = vmatmul.bf16.gmra.mxu0 %v3808_v56  ;;  %v1159_v62 = vadd.f32 %v1158_v7, %v1110_v16 }
 0x174   : > { %v1298_v55 = vmax.f32 %v1254_v54, 0.0  ;;  %1709 = vmatmul.bf16.gmra.mxu1 %v3816_v2  ;;  %1947 = vmatpush.bf16.msrb.mxu2 %v3948_v52 }
 0x175   : > { %1936 = vmatpush.bf16.msrb.mxu1 %v3820_v21  ;;  %v1301_v12 = vmax.f32 %v1159_v62, 0.0 }
 0x176   : > { %v3955_v57 = vpack.c.bf16 %v1298_v55, %v1294_v6 }
 0x177   : > { %v1207_v9 = vpop.f32.mrf.mxu2 }
 0x178   : > { %v1256_v11 = vpop.f32.mrf.mxu3  ;;  %1802 = vmatmul.bf16.vlgmr.msra.gmra.mxu3 %v3955_v57  ;;  %1948 = vmatpush.bf16.msrb.mxu2 %v3842_v0  ;;  %v1111_v35 = vpop.f32.mrf.mxu0  ;;  %v1208_v10 = vadd.f32 %v1207_v9, %v3925_v53 }
 0x179   : > { %v1112_v46 = vadd.f32 %v1111_v35, %v3902_v58  ;;  %v1160_v63 = vpop.f32.mrf.mxu1  ;;  %1937 = vmatpush.bf16.msrb.mxu1 %v3808_v56 }
 0x17a   : > { %v1257_v15 = vadd.f32 %v1256_v11, %v1208_v10 }
 0x17b   : > { %v1161_v23 = vadd.f32 %v1160_v63, %v1112_v46 }
 0x17c   : > { %1949 = vmatpush.bf16.msrb.mxu2 %v3828_v41  ;;  %v1302_v18 = vmax.f32 %v1257_v15, 0.0 }
 0x17d   : > { %v1305_v44 = vmax.f32 %v1161_v23, 0.0  ;;  %1938 = vmatpush.bf16.msrb.mxu1 %v3796_v27 }
 0x17f   : > { %v1209_v50 = vpop.f32.mrf.mxu2  ;;  %v3964_v39 = vpack.c.bf16 %v1305_v44, %v1301_v12 }
 0x180   : > { %v1210_v3 = vadd.f32 %v1209_v50, %v3925_v53  ;;  %v1258_v13 = vpop.f32.mrf.mxu3  ;;  %1950 = vmatpush.bf16.msrb.mxu2 %v3816_v2  ;;  %v1114_v24 = vpop.f32.mrf.mxu0 }
 0x181   : > { %v1163_v56 = vpop.f32.mrf.mxu1  ;;  %1758 = vmatmul.bf16.gmra.mxu2 %v3964_v39  ;;  %v1115_v27 = vadd.f32 %v1114_v24, %v3902_v58 }
 0x182   : > { %v1259_v30 = vadd.f32 %v1258_v13, %v1210_v3 }
 0x183   : > { %1665 = vmatmul.bf16.gmra.mxu0 %v3820_v21  ;;  %v1164_v19 = vadd.f32 %v1163_v56, %v1115_v27 }
 0x184   : > { %v1306_v25 = vmax.f32 %v1259_v30, 0.0  ;;  %1714 = vmatmul.bf16.gmra.mxu1 %v3828_v41  ;;  %1951 = vmatpush.bf16.msrb.mxu2 %v3804_v36 }
 0x185   : > { %v1309_v28 = vmax.f32 %v1164_v19, 0.0 }
 0x186   : > { %v3973_v22 = vpack.c.bf16 %v1306_v25, %v1302_v18 }
 0x187   : > { %v1212_v26 = vpop.f32.mrf.mxu2 }
 0x188   : > { %v1261_v14 = vpop.f32.mrf.mxu3  ;;  %1807 = vmatmul.bf16.gmra.mxu3 %v3973_v22  ;;  %v1116_v2 = vpop.f32.mrf.mxu0  ;;  %v1213_v4 = vadd.f32 %v1212_v26, %v3925_v53 }
 0x189   : > { %v1117_v43 = vadd.f32 %v1116_v2, %v3902_v58  ;;  %v1165_v40 = vpop.f32.mrf.mxu1 }
 0x18a   : > { %v1262_v33 = vadd.f32 %v1261_v14, %v1213_v4 }
 0x18b   : > { %v1166_v21 = vadd.f32 %v1165_v40, %v1117_v43 }
 0x18c   : > { %v1310_v38 = vmax.f32 %v1262_v33, 0.0 }
 0x18d   : > { %v1313_v41 = vmax.f32 %v1166_v21, 0.0 }
 0x18f   : > { %v1214_v29 = vpop.f32.mrf.mxu2  ;;  %v3978_v36 = vpack.c.bf16 %v1313_v41, %v1309_v28 }
 0x190   : > { %v1215_v5 = vadd.f32 %v1214_v29, %v3925_v53  ;;  %v1263_v59 = vpop.f32.mrf.mxu3  ;;  %v1119_v34 = vpop.f32.mrf.mxu0 }
 0x191   : > { %v1168_v60 = vpop.f32.mrf.mxu1  ;;  %1763 = vmatmul.bf16.gmra.mxu2 %v3978_v36  ;;  %v1120_v45 = vadd.f32 %v1119_v34, %v3902_v58 }
 0x192   : > { %v1264_v20 = vadd.f32 %v1263_v59, %v1215_v5 }
 0x193   : > { %1670 = vmatmul.bf16.gmra.mxu0 %v3832_v51  ;;  %v1169_v6 = vadd.f32 %v1168_v60, %v1120_v45 }
 0x194   : > { %v1314_v42 = vmax.f32 %v1264_v20, 0.0  ;;  %1719 = vmatmul.bf16.gmra.mxu1 %v3842_v0 }
 0x195   : > { %v1317_v11 = vmax.f32 %v1169_v6, 0.0 }
 0x196   : > { %v3985_v32 = vpack.c.bf16 %v1314_v42, %v1310_v38 }
 0x197   : > { %v1217_v49 = vpop.f32.mrf.mxu2 }
 0x198   : > { %v1266_v7 = vpop.f32.mrf.mxu3  ;;  %1812 = vmatmul.bf16.gmra.mxu3 %v3985_v32  ;;  %v1121_v54 = vpop.f32.mrf.mxu0  ;;  %v1218_v51 = vadd.f32 %v1217_v49, %v3925_v53 }
 0x199   : > { %v1122_v55 = vadd.f32 %v1121_v54, %v3902_v58  ;;  %v1170_v16 = vpop.f32.mrf.mxu1 }
 0x19a   : > { %v1267_v46 = vadd.f32 %v1266_v7, %v1218_v51 }
 0x19b   : > { %v1171_v9 = vadd.f32 %v1170_v16, %v1122_v55 }
 0x19c   : > { %v1318_v50 = vmax.f32 %v1267_v46, 0.0 }
 0x19d   : > { %v1321_v35 = vmax.f32 %v1171_v9, 0.0 }
 0x19f   : > { %v1219_v62 = vpop.f32.mrf.mxu2  ;;  %v3990_v0 = vpack.c.bf16 %v1321_v35, %v1317_v11 }
 0x1a0   : > { %v1220_v63 = vadd.f32 %v1219_v62, %v3925_v53  ;;  %v1268_v23 = vpop.f32.mrf.mxu3  ;;  %v1124_v10 = vpop.f32.mrf.mxu0 }
 0x1a1   : > { %v1173_v12 = vpop.f32.mrf.mxu1  ;;  %1768 = vmatmul.bf16.gmra.mxu2 %v3990_v0  ;;  %v1125_v3 = vadd.f32 %v1124_v10, %v3902_v58 }
 0x1a2   : > { %v1269_v44 = vadd.f32 %v1268_v23, %v1220_v63 }
 0x1a3   : > { %1675 = vmatmul.bf16.gmra.mxu0 %v3934_v8  ;;  %v1174_v18 = vadd.f32 %v1173_v12, %v1125_v3 }
 0x1a4   : > { %v1322_v15 = vmax.f32 %v1269_v44, 0.0  ;;  %1724 = vmatmul.bf16.gmra.mxu1 %v3948_v52 }
 0x1a5   : > { %v1325_v14 = vmax.f32 %v1174_v18, 0.0 }
 0x1a6   : > { %v3997_v13 = vpack.c.bf16 %v1322_v15, %v1318_v50 }
 0x1a7   : > { %v1222_v24 = vpop.f32.mrf.mxu2 }
 0x1a8   : > { %v1271_v56 = vpop.f32.mrf.mxu3  ;;  %1817 = vmatmul.bf16.gmra.mxu3 %v3997_v13  ;;  %v1126_v30 = vpop.f32.mrf.mxu0  ;;  %v1223_v8 = vadd.f32 %v1222_v24, %v3925_v53 }
 0x1a9   : > { %v1127_v25 = vadd.f32 %v1126_v30, %v3902_v58  ;;  %v1175_v27 = vpop.f32.mrf.mxu1 }
 0x1aa   : > { %v1272_v43 = vadd.f32 %v1271_v56, %v1223_v8 }
 0x1ab   : > { %v1176_v26 = vadd.f32 %v1175_v27, %v1127_v25 }
 0x1ac   : > { %v1326_v29 = vmax.f32 %v1272_v43, 0.0 }
 0x1ad   : > { %v1329_v2 = vmax.f32 %v1176_v26, 0.0 }
 0x1af   : > { %v1224_v19 = vpop.f32.mrf.mxu2  ;;  %v4002_v52 = vpack.c.bf16 %v1329_v2, %v1325_v14 }
 0x1b0   : > { %v1225_v40 = vadd.f32 %v1224_v19, %v3925_v53  ;;  %v1273_v21 = vpop.f32.mrf.mxu3  ;;  %v1129_v4 = vpop.f32.mrf.mxu0 }
 0x1b1   : > { %v1178_v28 = vpop.f32.mrf.mxu1  ;;  %1773 = vmatmul.bf16.gmra.mxu2 %v4002_v52  ;;  %v1130_v5 = vadd.f32 %v1129_v4, %v3902_v58 }
 0x1b2   : > { %v1274_v41 = vadd.f32 %v1273_v21, %v1225_v40 }
 0x1b3   : > { %1680 = vmatmul.bf16.gmra.mxu0 %v3921_v47  ;;  %v1179_v38 = vadd.f32 %v1178_v28, %v1130_v5 }
 0x1b4   : > { %v1330_v33 = vmax.f32 %v1274_v41, 0.0  ;;  %1729 = vmatmul.bf16.gmra.mxu1 %v3939_v37 }
 0x1b5   : > { %v1333_v7 = vmax.f32 %v1179_v38, 0.0 }
 0x1b6   : > { %v4009_v59 = vpack.c.bf16 %v1330_v33, %v1326_v29 }
 0x1b7   : > { %v1227_v34 = vpop.f32.mrf.mxu2 }
 0x1b8   : > { %v1276_v60 = vpop.f32.mrf.mxu3  ;;  %1822 = vmatmul.bf16.gmra.mxu3 %v4009_v59  ;;  %v1131_v20 = vpop.f32.mrf.mxu0  ;;  %v1228_v47 = vadd.f32 %v1227_v34, %v3925_v53 }
 0x1b9   : > { %v1132_v42 = vadd.f32 %v1131_v20, %v3902_v58  ;;  %v1180_v45 = vpop.f32.mrf.mxu1 }
 0x1ba   : > { %v1277_v55 = vadd.f32 %v1276_v60, %v1228_v47 }
 0x1bb   : > { %v1181_v49 = vadd.f32 %v1180_v45, %v1132_v42 }
 0x1bc   : > { %v1334_v62 = vmax.f32 %v1277_v55, 0.0 }
 0x1bd   : > { %v1337_v54 = vmax.f32 %v1181_v49, 0.0 }
 0x1bf   : > { %v4014_v6 = vpack.c.bf16 %v1337_v54, %v1333_v7  ;;  %v1229_v37 = vpop.f32.mrf.mxu2 }
 0x1c0   : > { %v1230_v16 = vadd.f32 %v1229_v37, %v3925_v53  ;;  %v1278_v9 = vpop.f32.mrf.mxu3  ;;  %v1134_v51 = vpop.f32.mrf.mxu0 }
 0x1c1   : > { %v1183_v11 = vpop.f32.mrf.mxu1  ;;  %1778 = vmatmul.bf16.gmra.mxu2 %v4014_v6  ;;  %v1135_v63 = vadd.f32 %v1134_v51, %v3902_v58 }
 0x1c2   : > { %v1279_v35 = vadd.f32 %v1278_v9, %v1230_v16 }
 0x1c3   : > { %1685 = vmatmul.bf16.gmra.mxu0 %v3909_v1  ;;  %v1184_v50 = vadd.f32 %v1183_v11, %v1135_v63 }
 0x1c4   : > { %v1338_v46 = vmax.f32 %v1279_v35, 0.0  ;;  %1734 = vmatmul.bf16.gmra.mxu1 %v3932_v31 }
 0x1c5   : > { %v1341_v56 = vmax.f32 %v1184_v50, 0.0 }
 0x1c6   : > { %v4021_v23 = vpack.c.bf16 %v1338_v46, %v1334_v62 }
 0x1c7   : > { %v1232_v10 = vpop.f32.mrf.mxu2 }
 0x1c8   : > { %v1281_v12 = vpop.f32.mrf.mxu3  ;;  %1827 = vmatmul.bf16.gmra.mxu3 %v4021_v23  ;;  %v1136_v44 = vpop.f32.mrf.mxu0  ;;  %v1233_v1 = vadd.f32 %v1232_v10, %v3925_v53 }
 0x1c9   : > { %v1137_v15 = vadd.f32 %v1136_v44, %v3902_v58  ;;  %v1185_v3 = vpop.f32.mrf.mxu1 }
 0x1ca   : > { %v1282_v25 = vadd.f32 %v1281_v12, %v1233_v1 }
 0x1cb   : > { %v1186_v24 = vadd.f32 %v1185_v3, %v1137_v15 }
 0x1cc   : > { %v1342_v19 = vmax.f32 %v1282_v25, 0.0 }
 0x1cd   : > { %v1345_v30 = vmax.f32 %v1186_v24, 0.0 }
 0x1cf   : > { %v1381_v18 = vpack.c.bf16 %v1345_v30, %v1341_v56  ;;  %v1234_v31 = vpop.f32.mrf.mxu2 }
 0x1d0   : > { %v1235_v27 = vadd.f32 %v1234_v31, %v3925_v53  ;;  %v1283_v26 = vpop.f32.mrf.mxu3  ;;  %v1139_v8 = vpop.f32.mrf.mxu0 }
 0x1d1   : > { %v1188_v14 = vpop.f32.mrf.mxu1  ;;  %1783 = vmatmul.bf16.gmra.mxu2 %v1381_v18  ;;  %v1140_v40 = vadd.f32 %v1139_v8, %v3902_v58 }
 0x1d2   : > { %v1284_v2 = vadd.f32 %v1283_v26, %v1235_v27 }
 0x1d3   : > { %1690 = vmatmul.bf16.gmra.mxu0 %v3896_v48  ;;  %v1189_v29 = vadd.f32 %v1188_v14, %v1140_v40 }
 0x1d4   : > { %v1346_v43 = vmax.f32 %v1284_v2, 0.0  ;;  %1739 = vmatmul.bf16.gmra.mxu1 %v3919_v17  ;;  %v4038_v17 = vld [vmem:[%s4138_s5] ss:$0 sm:$0xff] }
 0x1d5   : > { %v1349_v60 = vmax.f32 %v1189_v29, 0.0 }
 0x1d6   : > { %v4030_v21 = vpack.c.bf16 %v1346_v43, %v1342_v19 }
 0x1d7   : > { %v1237_v4 = vpop.f32.mrf.mxu2 }
 0x1d8   : > { %v1286_v28 = vpop.f32.mrf.mxu3  ;;  %1832 = vmatmul.bf16.gmra.mxu3 %v4030_v21  ;;  %v1141_v41 = vpop.f32.mrf.mxu0  ;;  %v1238_v48 = vadd.f32 %v1237_v4, %v3925_v53 }
 0x1d9   : > { %v1142_v33 = vadd.f32 %v1141_v41, %v3902_v58  ;;  %v1190_v5 = vpop.f32.mrf.mxu1 }
 0x1da   : > { %v1287_v45 = vadd.f32 %v1286_v28, %v1238_v48 }
 0x1db   : > { %v1191_v34 = vadd.f32 %v1190_v5, %v1142_v33 }
 0x1dc   : > { %v1350_v16 = vmax.f32 %v1287_v45, 0.0 }
 0x1dd   : > { %v1353_v20 = vmax.f32 %v1191_v34, 0.0 }
 0x1df   : > { %v1385_v38 = vpack.c.bf16 %v1353_v20, %v1349_v60  ;;  %v1239_v42 = vpop.f32.mrf.mxu2 }
 0x1e0   : > { %v1240_v49 = vadd.f32 %v1239_v42, %v3925_v53  ;;  %v1656_v47 = vpop.f32.mrf.mxu0  ;;  %v1288_v7 = vpop.f32.mrf.mxu3 }
 0x1e1   : > { %v1657_v58 = vadd.f32 %v4038_v17, %v1656_v47  ;;  %v1705_v54 = vpop.f32.mrf.mxu1  ;;  %1788 = vmatmul.bf16.gmra.mxu2 %v1385_v38  ;;  %1957 = vmatpush.bf16.msrb.mxu3 %v1385_v38 }
 0x1e2   : > { %v1289_v37 = vadd.f32 %v1288_v7, %v1240_v49 }
 0x1e3   : > { %v1706_v55 = vadd.f32 %v1705_v54, %v1657_v58 }
 0x1e4   : > { %v1354_v9 = vmax.f32 %v1289_v37, 0.0 }
 0x1e5   : > { %1958 = vmatpush.bf16.msrb.mxu3 %v1381_v18 }
 0x1e6   : > { %v4042_v51 = vpack.c.bf16 %v1354_v9, %v1350_v16 }
 0x1e8   : > { %1837 = vmatmul.bf16.gmra.mxu3 %v4042_v51  ;;  %v1658_v11 = vpop.f32.mrf.mxu0 }
 0x1e9   : > { %v1659_v35 = vadd.f32 %v4038_v17, %v1658_v11  ;;  %v1707_v53 = vpop.f32.mrf.mxu1  ;;  %1959 = vmatpush.bf16.msrb.mxu3 %v4014_v6 }
 0x1eb   : > { %v1708_v62 = vadd.f32 %v1707_v53, %v1659_v35 }
 0x1ed   : > { %1960 = vmatpush.bf16.msrb.mxu3 %v4002_v52 }
 0x1f0   : > { %v1661_v46 = vpop.f32.mrf.mxu0 }
 0x1f1   : > { %v1662_v63 = vadd.f32 %v4038_v17, %v1661_v46  ;;  %v1710_v10 = vpop.f32.mrf.mxu1  ;;  %1961 = vmatpush.bf16.msrb.mxu3 %v3990_v0 }
 0x1f3   : > { %v1711_v12 = vadd.f32 %v1710_v10, %v1662_v63 }
 0x1f4   : > { %v1754_v44 = vpop.f32.mrf.mxu2 }
 0x1f5   : > { %v1755_v50 = vadd.f32 %v1754_v44, %v1706_v55  ;;  %1962 = vmatpush.bf16.msrb.mxu3 %v3978_v36 }
 0x1f8   : > { %v1663_v15 = vpop.f32.mrf.mxu0 }
 0x1f9   : > { %v1664_v3 = vadd.f32 %v4038_v17, %v1663_v15  ;;  %v1712_v24 = vpop.f32.mrf.mxu1  ;;  %1963 = vmatpush.bf16.msrb.mxu3 %v3964_v39 }
 0x1fb   : > { %v1713_v6 = vadd.f32 %v1712_v24, %v1664_v3  ;;  %v1803_v1 = vpop.f32.mrf.mxu3 }
 0x1fc   : > { %v4053_v52 = vadd.f32 %v1803_v1, %v1755_v50  ;;  %v1756_v56 = vpop.f32.mrf.mxu2 }
 0x1fd   : > { %v1757_v30 = vadd.f32 %v1756_v56, %v1708_v62  ;;  %1964 = vmatpush.bf16.msrb.mxu3 %v3941_v61 }
 0x200   : > { %v1666_v0 = vpop.f32.mrf.mxu0 }
 0x201   : > { %v1667_v18 = vadd.f32 %v4038_v17, %v1666_v0  ;;  %v1715_v31 = vpop.f32.mrf.mxu1 }
 0x203   : > { %v1716_v25 = vadd.f32 %v1715_v31, %v1667_v18  ;;  %v1805_v36 = vpop.f32.mrf.mxu3 }
 0x204   : > { %v4057_v27 = vadd.f32 %v1805_v36, %v1757_v30  ;;  %v1759_v26 = vpop.f32.mrf.mxu2 }
 0x205   : > { %v1760_v8 = vadd.f32 %v1759_v26, %v1711_v12 }
 0x208   : > { %v1668_v14 = vpop.f32.mrf.mxu0 }
 0x209   : > { %v1669_v39 = vadd.f32 %v4038_v17, %v1668_v14  ;;  %v1717_v2 = vpop.f32.mrf.mxu1 }
 0x20b   : > { %v1718_v19 = vadd.f32 %v1717_v2, %v1669_v39  ;;  %v1808_v43 = vpop.f32.mrf.mxu3 }
 0x20c   : > { %v4060_v40 = vadd.f32 %v1808_v43, %v1760_v8  ;;  %v1761_v4 = vpop.f32.mrf.mxu2 }
 0x20d   : > { %v1762_v61 = vadd.f32 %v1761_v4, %v1713_v6 }
 0x210   : > { %v1671_v28 = vpop.f32.mrf.mxu0 }
 0x211   : > { %v1672_v41 = vadd.f32 %v4038_v17, %v1671_v28  ;;  %v1720_v29 = vpop.f32.mrf.mxu1 }
 0x213   : > { %v1721_v33 = vadd.f32 %v1720_v29, %v1672_v41  ;;  %v1810_v5 = vpop.f32.mrf.mxu3 }
 0x214   : > { %v4063_v34 = vadd.f32 %v1810_v5, %v1762_v61  ;;  %v1764_v48 = vpop.f32.mrf.mxu2 }
 0x215   : > { %v1765_v60 = vadd.f32 %v1764_v48, %v1716_v25 }
 0x218   : > { %v1673_v20 = vpop.f32.mrf.mxu0 }
 0x219   : > { %v1674_v38 = vadd.f32 %v4038_v17, %v1673_v20  ;;  %v1722_v42 = vpop.f32.mrf.mxu1 }
 0x21b   : > { %v1723_v45 = vadd.f32 %v1722_v42, %v1674_v38  ;;  %v1813_v49 = vpop.f32.mrf.mxu3 }
 0x21c   : > { %v4066_v47 = vadd.f32 %v1813_v49, %v1765_v60  ;;  %v1766_v7 = vpop.f32.mrf.mxu2 }
 0x21d   : > { %v1767_v58 = vadd.f32 %v1766_v7, %v1718_v19 }
 0x220   : > { %v1676_v54 = vpop.f32.mrf.mxu0 }
 0x221   : > { %v1677_v37 = vadd.f32 %v4038_v17, %v1676_v54  ;;  %v1725_v55 = vpop.f32.mrf.mxu1 }
 0x223   : > { %v1726_v16 = vadd.f32 %v1725_v55, %v1677_v37  ;;  %v1815_v9 = vpop.f32.mrf.mxu3 }
 0x224   : > { %v4069_v11 = vadd.f32 %v1815_v9, %v1767_v58  ;;  %v1769_v35 = vpop.f32.mrf.mxu2 }
 0x225   : > { %v1770_v53 = vadd.f32 %v1769_v35, %v1721_v33 }
 0x228   : > { %v1678_v62 = vpop.f32.mrf.mxu0 }
 0x229   : > { %v1679_v46 = vadd.f32 %v4038_v17, %v1678_v62  ;;  %v1727_v63 = vpop.f32.mrf.mxu1 }
 0x22b   : > { %v1728_v10 = vadd.f32 %v1727_v63, %v1679_v46  ;;  %v1818_v12 = vpop.f32.mrf.mxu3 }
 0x22c   : > { %v4072_v44 = vadd.f32 %v1818_v12, %v1770_v53  ;;  %v1771_v50 = vpop.f32.mrf.mxu2 }
 0x22d   : > { %v1772_v15 = vadd.f32 %v1771_v50, %v1723_v45 }
 0x230   : > { %v1681_v56 = vpop.f32.mrf.mxu0 }
 0x231   : > { %v1730_v31 = vpop.f32.mrf.mxu1 }
 0x233   : > { %v1820_v3 = vpop.f32.mrf.mxu3 }
 0x234   : > { %v4074_v24 = vadd.f32 %v1820_v3, %v1772_v15  ;;  %v1774_v6 = vpop.f32.mrf.mxu2 }
 0x235   : > { %v1775_v1 = vadd.f32 %v1774_v6, %v1726_v16 }
 0x238   : > { %v1683_v36 = vpop.f32.mrf.mxu0 }
 0x239   : > { %v1732_v39 = vpop.f32.mrf.mxu1  ;;  %v1684_v50 = vadd.f32 %v4038_v17, %v1683_v36 }
 0x23b   : > { %v1823_v30 = vpop.f32.mrf.mxu3 }
 0x23c   : > { %v4076_v0 = vadd.f32 %v1823_v30, %v1775_v1  ;;  %v1776_v18 = vpop.f32.mrf.mxu2  ;;  %v1682_v30 = vadd.f32 %v4038_v17, %v1681_v56 }
 0x23d   : > { %v1777_v25 = vadd.f32 %v1776_v18, %v1728_v10  ;;  %v1733_v18 = vadd.f32 %v1732_v39, %v1684_v50  ;;  %v1922_v50 = vld [vmem:[#allocation4] sm:$0xf] }
 0x240   : > { %v1686_v2 = vpop.f32.mrf.mxu0 }
 0x241   : > { %v1735_v4 = vpop.f32.mrf.mxu1  ;;  %v1687_v46 = vadd.f32 %v4038_v17, %v1686_v2  ;;  %v1731_v2 = vadd.f32 %v1730_v31, %v1682_v30 }
 0x243   : > { %v1825_v26 = vpop.f32.mrf.mxu3  ;;  %v1736_v15 = vadd.f32 %v1735_v4, %v1687_v46 }
 0x244   : > { %v1826_v8 = vadd.f32 %v1825_v26, %v1777_v25  ;;  %v1779_v14 = vpop.f32.mrf.mxu2 }
 0x248   : > { %v1688_v41 = vpop.f32.mrf.mxu0 }
 0x249   : > { %v1737_v29 = vpop.f32.mrf.mxu1  ;;  %v1689_v55 = vadd.f32 %v4038_v17, %v1688_v41 }
 0x24b   : > { %v1828_v19 = vpop.f32.mrf.mxu3  ;;  %v1738_v63 = vadd.f32 %v1737_v29, %v1689_v55 }
 0x24c   : > { %v1781_v43 = vpop.f32.mrf.mxu2 }
 0x24d   : > { %v1782_v41 = vadd.f32 %v1781_v43, %v1733_v18 }
 0x250   : > { %v1691_v48 = vpop.f32.mrf.mxu0 }
 0x251   : > { %v1740_v20 = vpop.f32.mrf.mxu1  ;;  %v1692_v7 = vadd.f32 %v4038_v17, %v1691_v48  ;;  %v1780_v48 = vadd.f32 %v1779_v14, %v1731_v2 }
 0x253   : > { %v1830_v61 = vpop.f32.mrf.mxu3  ;;  %v1741_v16 = vadd.f32 %v1740_v20, %v1692_v7  ;;  %v1829_v36 = vadd.f32 %v1828_v19, %v1780_v48  ;;  %v3508_v19 = vmov 0  }
 0x254   : > { %v1784_v28 = vpop.f32.mrf.mxu2  ;;  %v1831_v29 = vadd.f32 %v1830_v61, %v1782_v41  ;;  %3259 = vset.pattern.permute.xlu0 %v3508_v19  ;;  %3260 = vset.pattern.permute.xlu1 %v3508_v19 }
 0x255   : > { %v1785_v1 = vadd.f32 %v1784_v28, %v1736_v15 }
 0x258   : > { %v1693_v42 = vpop.f32.mrf.mxu0 }
 0x259   : > { %v1694_v49 = vadd.f32 %v4038_v17, %v1693_v42  ;;  %v1742_v58 = vpop.f32.mrf.mxu1 }
 0x25b   : > { %v1833_v33 = vpop.f32.mrf.mxu3  ;;  %v1743_v37 = vadd.f32 %v1742_v58, %v1694_v49 }
 0x25c   : > { %v1786_v5 = vpop.f32.mrf.mxu2  ;;  %v1834_v25 = vadd.f32 %v1833_v33, %v1785_v1 }
 0x25d   : > { %v1787_v12 = vadd.f32 %v1786_v5, %v1738_v63 }
 0x263   : > { %v1835_v60 = vpop.f32.mrf.mxu3 }
 0x264   : > { %v1789_v38 = vpop.f32.mrf.mxu2  ;;  %v1836_v3 = vadd.f32 %v1835_v60, %v1787_v12 }
 0x265   : > { %v1790_v53 = vadd.f32 %v1789_v38, %v1741_v16  ;;  %v1914_v16 = vld [vmem:[#allocation3] sm:$0x1] }
 0x26b   : > { %v1838_v45 = vpop.f32.mrf.mxu3 }
 0x26c   : > { %v1791_v54 = vpop.f32.mrf.mxu2  ;;  %v1839_v10 = vadd.f32 %v1838_v45, %v1790_v53 }
 0x26d   : > { %v1792_v9 = vadd.f32 %v1791_v54, %v1743_v37 }
 0x273   : > { %v1840_v35 = vpop.f32.mrf.mxu3 }
 0x274   : > { %v1841_v62 = vadd.f32 %v1840_v35, %v1792_v9 }
 0x276   : > { %3262 = vtanh.f32 %v1841_v62 }
 0x277   : > { %3264 = vtanh.f32 %v1839_v10 }
 0x278   : > { %3266 = vtanh.f32 %v1836_v3 }
 0x279   : > { %3268 = vtanh.f32 %v1834_v25 }
 0x27a   : > { %3270 = vtanh.f32 %v1831_v29 }
 0x27b   : > { %3272 = vtanh.f32 %v1829_v36 }
 0x27c   : > { %v3263_v6 = vpop.eup %3262  ;;  %3274 = vtanh.f32 %v1826_v8  ;;  %v1860_v8 = vld [vmem:[#allocation7] sm:$0x1] }
 0x27d   : > { %1867 = vmatpush.xpose.msrb.mxu0 %v3263_v6  ;;  %v3265_v26 = vpop.eup %3264  ;;  %3276 = vtanh.f32 %v4076_v0  ;;  %1863 = vperm.xlu0 %3259, %v1860_v8  }
 0x27e   : > { %v3267_v5 = vpop.eup %3266  ;;  %3278 = vtanh.f32 %v4074_v24 }
 0x27f   : > { %v3269_v4 = vpop.eup %3268  ;;  %3280 = vtanh.f32 %v4072_v44 }
 0x280   : > { %v3271_v28 = vpop.eup %3270  ;;  %3282 = vtanh.f32 %v4069_v11 }
 0x281   : > { %1868 = vmatpush.xpose.msrb.mxu0 %v3265_v26  ;;  %v3273_v17 = vpop.eup %3272  ;;  %3284 = vtanh.f32 %v4066_v47 }
 0x282   : > { %v3275_v56 = vpop.eup %3274  ;;  %3286 = vtanh.f32 %v4063_v34  ;;  %v1859_v34 = vld [vmem:[%s4139_s6] sm:$0x1] }
 0x283   : > { %v3277_v31 = vpop.eup %3276  ;;  %3288 = vtanh.f32 %v4060_v40 }
 0x284   : > { %v3279_v14 = vpop.eup %3278  ;;  %3290 = vtanh.f32 %v4057_v27  ;;  %v1890_v27 = vstv %s2892_s28 }
 0x285   : > { %1869 = vmatpush.xpose.msrb.mxu0 %v3267_v5  ;;  %v3281_v39 = vpop.eup %3280  ;;  %3292 = vtanh.f32 %v4053_v52  ;;  %v1888_v52 = vlaneseq }
 0x286   : > { %v3283_v0 = vpop.eup %3282 }
 0x287   : > { %v3285_v24 = vpop.eup %3284  ;;  %vm1999_vm7 = vcmp.lt.s32.totalorder %v1888_v52, 512 }
 0x288   : > { %v3287_v44 = vpop.eup %3286 }
 0x289   : > { %1870 = vmatpush.xpose.msrb.mxu0 %v3269_v4  ;;  %v3289_v11 = vpop.eup %3288 }
 0x28a   : > { %v3291_v47 = vpop.eup %3290 }
 0x28b   : > { %v3293_v43 = vpop.eup %3292 }
 0x28d   : > { %1871 = vmatpush.xpose.msrb.mxu0 %v3271_v28 }
 0x291   : > { %1872 = vmatpush.xpose.msrb.mxu0 %v3273_v17 }
 0x295   : > { %1873 = vmatpush.xpose.msrb.mxu0 %v3275_v56 }
 0x299   : > { %1874 = vmatpush.xpose.msrb.mxu0 %v3277_v31 }
 0x29d   : > { %1875 = vmatpush.xpose.msrb.mxu0 %v3279_v14 }
 0x2a1   : > { %1876 = vmatpush.xpose.msrb.mxu0 %v3281_v39 }
 0x2a5   : > { %1877 = vmatpush.xpose.msrb.mxu0 %v3283_v0 }
 0x2a9   : > { %1878 = vmatpush.xpose.msrb.mxu0 %v3285_v24 }
 0x2ad   : > { %1879 = vmatpush.xpose.msrb.mxu0 %v3287_v44 }
 0x2b1   : > { %1880 = vmatpush.xpose.msrb.mxu0 %v3289_v11 }
 0x2b5   : > { %1881 = vmatpush.xpose.msrb.mxu0 %v3291_v47 }
 0x2b9   : > { %1882 = vmatpush.xpose.msrb.mxu0 %v3293_v43 }
 0x2bc   : > { %1883 = vmatmul.f32.vlgmr.msrb.gmra.mxu0 %v1859_v34 }
 0x2bd   : > { %1970 = vmatpush.bf16.msra.mxu0 %v4042_v51  ;;  %v1889_v51 = vand.u32 127, %v1888_v52 }
 0x2c1   : > { %1971 = vmatpush.bf16.msra.mxu0 %v4030_v21  ;;  %v1891_v21 = vadd.s32 %v1890_v27, %v1889_v51 }
 0x2c5   : > { %1972 = vmatpush.bf16.msra.mxu0 %v4021_v23  ;;  %v1893_v23 = vstv %s1892_s25 }
 0x2c6   : > { %vm1894_vm2 = vcmp.lt.s32.totalorder %v1891_v21, %v1893_v23 }
 0x2c9   : > { %1973 = vmatpush.bf16.msra.mxu0 %v4009_v59 }
 0x2cd   : > { %1974 = vmatpush.bf16.msra.mxu0 %v3997_v13 }
 0x2d1   : > { %1975 = vmatpush.bf16.msra.mxu0 %v3985_v32 }
 0x2d5   : > { %1976 = vmatpush.bf16.msra.mxu0 %v3973_v22  ;;  %v1896_v22 = vld [vmem:[#allocation2] sm:$0x1] }
 0x2d9   : > { %1977 = vmatpush.bf16.msra.mxu0 %v3955_v57 }
 0x2ef   : > { %v1864_v40 = vpop.permute.xlu0 %1863 }
 0x2f0   : > { %v1866_v61 = vperm.slane %v1864_v40, 0 }
 0x339   : > { %v1884_v33 = vpop.f32.mrf.mxu0 }
 0x33a   : > { %v1885_v59 = vadd.f32 %v1884_v33, %v1866_v61 }
 0x33c   : > { %v1895_v13 = vsel %vm1894_vm2, %v1885_v59, -inf }
 0x33d   : > { %v1898_v32 = vsel %vm1897_vm3, %v1895_v13, -inf }
 0x33e   : > { %1899 = vmax.xlane.f32.xlu0 %v1898_v32 }
 0x3b1   : > { %v1900_v57 = vpop.xlane.xlu0 %1899 }
 0x3b2   : > { %v1901_v60 = vmax.f32 %v1896_v22, %v1900_v57 }
 0x3b4   : > { %v1902_v20 = vsub.f32 %v1896_v22, %v1901_v60  ;;  %2002 = vst.msk [vmem:[#allocation2] sm:$0x1] %vm1920_vm4, %v1901_v60  ;;  %1907 = vperm.xlu1 %3260, %v1901_v60  }
 0x3b6   : > { %v1903_v38 = vmul.f32 1.442695, %v1902_v20 }
 0x3b8   : > { %3294 = vpow2.f32 %v1903_v38 }
 0x3be   : > { %v3295_v42 = vpop.eup %3294 }
 0x3bf   : > { %1925 = vperm.xlu1 %3260, %v3295_v42   ;;  %v1915_v9 = vmul.f32 %v3295_v42, %v1914_v16 }
 0x426   : > { %v1908_v45 = vpop.permute.xlu1 %1907 }
 0x427   : > { %v1910_v49 = vperm.slane %v1908_v45, 0 }
 0x429   : > { %v1911_v7 = vsub.f32 %v1895_v13, %v1910_v49 }
 0x42b   : > { %v1912_v58 = vmul.f32 1.442695, %v1911_v7 }
 0x42d   : > { %3296 = vpow2.f32 %v1912_v58 }
 0x431   : > { %v1926_v63 = vpop.permute.xlu1 %1925 }
 0x432   : > { %v1928_v10 = vperm.slane %v1926_v63, 0 }
 0x433   : > { %v3297_v54 = vpop.eup %3296 }
 0x434   : > { %v1930_v37 = vpack.c.bf16 %v3297_v54, %v3297_v54  ;;  %v1916_v55 = vsel %vm1897_vm3, %v3297_v54, 0.0  ;;  %v1929_v26 = vmul.f32 %v1928_v10, %v1922_v50 }
 0x435   : > { %1917 = vadd.xlane.f32.xlu2 %v1916_v55 }
 0x436   : > { %1939 = vmatmul.bf16.vlgmr.msrb.gmra.mxu1 %v1930_v37  ;;  %1952 = vmatmul.bf16.vlgmr.msrb.gmra.mxu2 %v1930_v37 }
 0x437   : > { %1965 = vmatmul.bf16.vlgmr.msrb.gmra.mxu3 %v1930_v37  ;;  %1978 = vmatmul.bf16.vlgmr.msra.gmra.mxu0 %v1930_v37 }
 0x4a8   : > { %v1918_v35 = vpop.xlane.xlu2 %1917 }
 0x4a9   : > { %v1919_v53 = vadd.f32 %v1918_v35, %v1915_v9 }
 0x4ab   : > { %1921 = vst.msk [vmem:[#allocation3] sm:$0x1] %vm1920_vm4, %v1919_v53 }
 0x4b3   : > { %v1940_v62 = vpop.f32.mrf.mxu1 }
 0x4b4   : > { %v1979_v46 = vpop.f32.mrf.mxu0 }
 0x4b5   : > { %v1989_v6 = vrot.slane %v1979_v46, 5 }
 0x4b9   : > { %v1953_v12 = vpop.f32.mrf.mxu2 }
 0x4ba   : > { %v1987_v15 = vrot.slane %v1953_v12, 7  ;;  %v1966_v3 = vpop.f32.mrf.mxu3 }
 0x4bb   : > { %v1988_v1 = vrot.slane %v1966_v3, 6  ;;  %v1942_v30 = vpop.f32.mrf.mxu1 }
 0x4bc   : > { %v1990_v18 = vsel %vm1897_vm3, %v1940_v62, %v1987_v15  ;;  %v1981_v25 = vpop.f32.mrf.mxu0 }
 0x4bd   : > { %v1992_v41 = vsel %vm1991_vm5, %v1988_v1, %v1989_v6 }
 0x4be   : > { %v1994_v2 = vsel %vm1993_vm6, %v1990_v18, %v1992_v41  ;;  %2006 = sbr.rel (%p2893_p1) target bundleno = 1491 (0x5d3), region = 80 }
 0x4bf   : > { %v1996_v29 = vadd.f32 %v1994_v2, %v1929_v26 }
 0x4c1   : > { %2001 = vst.msk [vmem:[#allocation4] sm:$0xf] %vm1999_vm7, %v1996_v29  ;;  %v1955_v5 = vpop.f32.mrf.mxu2 }
 0x4c2   : > { %v1968_v48 = vpop.f32.mrf.mxu3 }
 0x4c3   : > { %v2007_v36 = vld [vmem:[#allocation3] sm:$0x1]  ;;  %v3509_v17 = vmov 0   ;;  %v3146_v14 = vld [vmem:[#allocation14 + $0x30] sm:$0xff]  ;;  %v3145_v0 = vld [vmem:[#allocation14 + $0x28] sm:$0xff] }
 0x4c4   : > { %v3147_v4 = vld [vmem:[#allocation14 + $0x38] sm:$0xff]  ;;  %3298 = vset.pattern.permute.xlu0 %v3509_v17  ;;  %3299 = vrcp.f32 %v2007_v36  ;;  %v3154_v39 = vld [vmem:[#allocation14 + $0x70] sm:$0xff]  ;;  %v3153_v24 = vld [vmem:[#allocation14 + $0x68] sm:$0xff] }
 0x4c5   : > { %v3155_v28 = vld [vmem:[#allocation14 + $0x78] sm:$0xff]  ;;  %2287 = vmatpush.bf16.msra.mxu0 %v3147_v4  ;;  %v3162_v8 = vld [vmem:[#allocation14 + $0xb0] sm:$0xff]  ;;  %v3161_v11 = vld [vmem:[#allocation14 + $0xa8] sm:$0xff] }
 0x4c6   : > { %v3163_v56 = vld [vmem:[#allocation14 + $0xb8] sm:$0xff]  ;;  %2300 = vmatpush.bf16.msra.mxu1 %v3155_v28  ;;  %v3170_v19 = vld [vmem:[#allocation14 + $0xf0] sm:$0xff]  ;;  %v3169_v47 = vld [vmem:[#allocation14 + $0xe8] sm:$0xff] }
 0x4c7   : > { %v3171_v31 = vld [vmem:[#allocation14 + $0xf8] sm:$0xff]  ;;  %2313 = vmatpush.bf16.msra.mxu2 %v3163_v56  ;;  %v3144_v43 = vld [vmem:[#allocation14 + $0x20] sm:$0xff]  ;;  %v3142_v23 = vld [vmem:[#allocation14 + $0x10] sm:$0xff] }
 0x4c8   : > { %2326 = vmatpush.bf16.msra.mxu3 %v3171_v31  ;;  %v3152_v34 = vld [vmem:[#allocation14 + $0x60] sm:$0xff]  ;;  %v3143_v27 = vld [vmem:[#allocation14 + $0x18] sm:$0xff]  ;;  %v3150_v33 = vld [vmem:[#allocation14 + $0x50] sm:$0xff] }
 0x4c9   : > { %2288 = vmatpush.bf16.msra.mxu0 %v3146_v14  ;;  %v3160_v52 = vld [vmem:[#allocation14 + $0xa0] sm:$0xff]  ;;  %v3151_v40 = vld [vmem:[#allocation14 + $0x58] sm:$0xff]  ;;  %v3158_v59 = vld [vmem:[#allocation14 + $0x90] sm:$0xff] }
 0x4ca   : > { %2301 = vmatpush.bf16.msra.mxu1 %v3154_v39  ;;  %v3300_v44 = vpop.eup %3299  ;;  %v3168_v51 = vld [vmem:[#allocation14 + $0xe0] sm:$0xff]  ;;  %v3159_v21 = vld [vmem:[#allocation14 + $0x98] sm:$0xff]  ;;  %v3166_v13 = vld [vmem:[#allocation14 + $0xd0] sm:$0xff] }
 0x4cb   : > { %2314 = vmatpush.bf16.msra.mxu2 %v3162_v8  ;;  %2012 = vperm.xlu0 %3298, %v3300_v44   ;;  %v3167_v61 = vld [vmem:[#allocation14 + $0xd8] sm:$0xff]  ;;  %v3141_v32 = vld [vmem:[#allocation14 + $0x8] sm:$0xff]  ;;  %v3140_v20 = vld [vmem:[#allocation14] sm:$0xff] }
 0x4cc   : > { %2327 = vmatpush.bf16.msra.mxu3 %v3170_v19  ;;  %v3149_v22 = vld [vmem:[#allocation14 + $0x48] sm:$0xff]  ;;  %v3148_v38 = vld [vmem:[#allocation14 + $0x40] sm:$0xff]  ;;  %v2009_v49 = vld [vmem:[#allocation4] sm:$0xf] }
 0x4cd   : > { %2289 = vmatpush.bf16.msra.mxu0 %v3145_v0  ;;  %v3157_v57 = vld [vmem:[#allocation14 + $0x88] sm:$0xff]  ;;  %v3156_v42 = vld [vmem:[#allocation14 + $0x80] sm:$0xff]  ;;  %v2094_v63 = vld [vmem:[%s4142_s9] sm:$0x1] }
 0x4ce   : > { %2302 = vmatpush.bf16.msra.mxu1 %v3153_v24  ;;  %v3165_v60 = vld [vmem:[#allocation14 + $0xc8] sm:$0xff]  ;;  %v3164_v45 = vld [vmem:[#allocation14 + $0xc0] sm:$0xff] }
 0x4cf   : > { %2315 = vmatpush.bf16.msra.mxu2 %v3161_v11 }
 0x4d0   : > { %2328 = vmatpush.bf16.msra.mxu3 %v3169_v47 }
 0x4d1   : > { %2290 = vmatpush.bf16.msra.mxu0 %v3144_v43 }
 0x4d2   : > { %2303 = vmatpush.bf16.msra.mxu1 %v3152_v34 }
 0x4d3   : > { %2316 = vmatpush.bf16.msra.mxu2 %v3160_v52 }
 0x4d4   : > { %2329 = vmatpush.bf16.msra.mxu3 %v3168_v51 }
 0x4d5   : > { %2291 = vmatpush.bf16.msra.mxu0 %v3143_v27 }
 0x4d6   : > { %2304 = vmatpush.bf16.msra.mxu1 %v3151_v40 }
 0x4d7   : > { %2317 = vmatpush.bf16.msra.mxu2 %v3159_v21 }
 0x4d8   : > { %2330 = vmatpush.bf16.msra.mxu3 %v3167_v61 }
 0x4d9   : > { %2292 = vmatpush.bf16.msra.mxu0 %v3142_v23 }
 0x4da   : > { %2305 = vmatpush.bf16.msra.mxu1 %v3150_v33 }
 0x4db   : > { %2318 = vmatpush.bf16.msra.mxu2 %v3158_v59 }
 0x4dc   : > { %2331 = vmatpush.bf16.msra.mxu3 %v3166_v13 }
 0x4dd   : > { %2293 = vmatpush.bf16.msra.mxu0 %v3141_v32 }
 0x4de   : > { %2306 = vmatpush.bf16.msra.mxu1 %v3149_v22 }
 0x4df   : > { %2319 = vmatpush.bf16.msra.mxu2 %v3157_v57 }
 0x4e0   : > { %2332 = vmatpush.bf16.msra.mxu3 %v3165_v60 }
 0x4e1   : > { %2294 = vmatpush.bf16.msra.mxu0 %v3140_v20 }
 0x4e2   : > { %2307 = vmatpush.bf16.msra.mxu1 %v3148_v38 }
 0x4e3   : > { %2320 = vmatpush.bf16.msra.mxu2 %v3156_v42 }
 0x4e4   : > { %2333 = vmatpush.bf16.msra.mxu3 %v3164_v45 }
 0x53d   : > { %v2013_v7 = vpop.permute.xlu0 %2012 }
 0x53e   : > { %v2015_v58 = vperm.slane %v2013_v7, 0 }
 0x540   : > { %v2016_v54 = vmul.f32 %v2015_v58, %v2009_v49 }
 0x542   : > { %v2018_v37 = vperm.slane %v2016_v54, 0  ;;  %v2019_v55 = vperm.slane %v2016_v54, 1  ;;  %v2020_v16 = vperm.slane %v2016_v54, 2  ;;  %v2021_v9 = vperm.slane %v2016_v54, 3 }
 0x544   : > { %v2026_v35 = vpack.c.bf16 %v2018_v37, %v2018_v37  ;;  %v2027_v53 = vpack.c.bf16 %v2019_v55, %v2019_v55  ;;  %v2028_v62 = vpack.c.bf16 %v2020_v16, %v2020_v16  ;;  %v2029_v46 = vpack.c.bf16 %v2021_v9, %v2021_v9 }
 0x546   : > { %2295 = vmatmul.bf16.vlgmr.msra.gmra.mxu0 %v2026_v35  ;;  %2308 = vmatmul.bf16.vlgmr.msra.gmra.mxu1 %v2027_v53 }
 0x547   : > { %2321 = vmatmul.bf16.vlgmr.msra.gmra.mxu2 %v2028_v62  ;;  %2334 = vmatmul.bf16.vlgmr.msra.gmra.mxu3 %v2029_v46 }
 0x5c3   : > { %v2296_v10 = vpop.f32.mrf.mxu0  ;;  %v2309_v12 = vpop.f32.mrf.mxu1 }
 0x5c4   : > { %v2297_v50 = vadd.f32 %v2296_v10, %v2094_v63 }
 0x5c6   : > { %v2310_v15 = vadd.f32 %v2309_v12, %v2297_v50 }
 0x5ca   : > { %v2322_v3 = vpop.f32.mrf.mxu2  ;;  %v2335_v6 = vpop.f32.mrf.mxu3 }
 0x5cb   : > { %v2323_v1 = vadd.f32 %v2322_v3, %v2310_v15  ;;  %v2298_v30 = vpop.f32.mrf.mxu0  ;;  %v2311_v18 = vpop.f32.mrf.mxu1 }
 0x5cd   : > { %v2336_v25 = vadd.f32 %v2335_v6, %v2323_v1 }
 0x5cf   : > { %2339 = vst [vmem:[#allocation16] sm:$0x1] %v2336_v25 }
 0x5d2   : > { %v2324_v26 = vpop.f32.mrf.mxu2  ;;  %v2337_v41 = vpop.f32.mrf.mxu3 }
 0x5d3 PF: > { %p3211_p4 = scmp.eq.s32.totalorder %s3591_s0, 2  ;;  %s3510_s14 = smov [#allocation16]  }
 0x5d4   : > { %s2346_s11 = sshll.u32 %s3510_s14, 4  ;;  %s2348_s15 = sshll.u32 %s4143_s10, 4  ;;  %s2347_s11 = int_to_ptr.vmem [resolvable:$true] %s2346_s11  ;;  %s2349_s15 = int_to_ptr.hbm [resolvable:$true] %s2348_s15 }
 0x5d5   : > { %3187 = dma.vmem_to_hbm [thread:$0]  (%p3211_p4), %s2347_s11, 16, %s2349_s15, [#allocation10]  }
 0x5d6   : > { %3478 = dma.done.wait (%p3211_p4), [#allocation10], 16  }
 0x5d7   : > { %3480 = vsyncadd (%p3211_p4), [#allocation10], 4294967280 }
 0x5d8 PF: > { %p26_p5 = scmp.ge.s32.totalorder %s3632_s26, 5   ;;  %s4148_s17 = smov %s3487_s18 }
 0x5d9   : > { %s4149_s18 = smov %s3491_s19  ;;  %s4150_s19 = smov %s3642_s30 }
 0x5da   : > { %s4151_s20 = smov %s3632_s26  ;;  %28 = sbr.rel (!%p26_p5) target bundleno = 9 (0x9), region = 113 }
 0x5df   :  { %2362 = vsyncpa [#allocation9], 1 }
 0x5e0   :  { %2364 = vsyncpa [#allocation9 + $0x1], 1 }
 0x5e1   :  { %2365 = vsyncpa [#allocation12], 1 }
 0x5e2   :  { %2366 = vsyncpa [#allocation15], 1 }
 0x5e3   :  { %2367 = vsyncpa [#allocation10], 1 }
 0x5e4   :  { %2369 = vsyncpa [#allocation10 + $0x1], 1 }

</bundles_post_ra>
